<compile_context>
chip_gen: v7x
topology: tpu7x:2x2x1
jax: 0.10.0
libtpu: 0.0.40
codegen_flags: <defaults>
</compile_context>

<pallas_src>
import math
from functools import partial

import jax
import jax.numpy as jnp
from jax.experimental import pallas as pl
from jax.experimental.pallas import tpu as pltpu
from jax.scipy.special import erf

_NE = 4          # num_experts
_K = 3           # top-k
_EXPERT_KS = (3, 5, 7, 9)


def _round_up(v, m):
    return ((v + m - 1) // m) * m


# ----------------------------------------------------------------------------
# Pallas kernel 1: tiled linear  y = x @ w + b   (bf16 operands, f32 accumulate)
# ----------------------------------------------------------------------------
def _linear_kernel(x_ref, w_ref, b_ref, o_ref, acc_ref):
    @pl.when(pl.program_id(2) == 0)
    def _init():
        acc_ref[...] = jnp.zeros_like(acc_ref)

    acc_ref[...] += jnp.dot(x_ref[...], w_ref[...],
                            preferred_element_type=jnp.float32)

    @pl.when(pl.program_id(2) == pl.num_programs(2) - 1)
    def _finalize():
        o_ref[...] = acc_ref[...] + b_ref[...]


def pallas_linear(x, w, b):
    """x: [M, K] @ w: [K, N] + b: [N] -> [M, N] float32."""
    M, K = x.shape
    K2, N = w.shape
    assert K == K2
    # Tile sizes sized well under the smallest (v7x, 64 MiB) VMEM budget:
    # 2*(tm*tk + tk*tn)*2B + 3*tm*tn*4B  ~= 3 MiB at (256, 512, 512).
    tm = min(256, _round_up(M, 16))
    tn = min(512, _round_up(N, 128))
    tk = min(512, _round_up(K, 128))
    Mp, Kp, Np = _round_up(M, tm), _round_up(K, tk), _round_up(N, tn)
    xp = jnp.zeros((Mp, Kp), jnp.bfloat16).at[:M, :K].set(x.astype(jnp.bfloat16))
    wp = jnp.zeros((Kp, Np), jnp.bfloat16).at[:K, :N].set(w.astype(jnp.bfloat16))
    bp = jnp.zeros((1, Np), jnp.float32).at[0, :N].set(jnp.asarray(b, jnp.float32))
    out = pl.pallas_call(
        _linear_kernel,
        out_shape=jax.ShapeDtypeStruct((Mp, Np), jnp.float32),
        grid=(Mp // tm, Np // tn, Kp // tk),
        in_specs=[
            pl.BlockSpec((tm, tk), lambda i, j, k: (i, k)),
            pl.BlockSpec((tk, tn), lambda i, j, k: (k, j)),
            pl.BlockSpec((1, tn), lambda i, j, k: (0, j)),
        ],
        out_specs=pl.BlockSpec((tm, tn), lambda i, j, k: (i, j)),
        scratch_shapes=[pltpu.VMEM((tm, tn), jnp.float32)],
        compiler_params=pltpu.CompilerParams(
            dimension_semantics=("parallel", "parallel", "arbitrary")),
    )(xp, wp, bp)
    return out[:M, :N]


# ----------------------------------------------------------------------------
# Pallas kernel 2: fused channels-last conv (in-kernel im2col), stride 1, no bias
# ----------------------------------------------------------------------------
def _make_conv_kernel(H, W, kh, kw):
    def kernel(x_ref, w_ref, o_ref):
        # x_ref: [1, Hp, Wp, Cin]; w_ref: [kh*kw, Cin, Cout]; o_ref: [1, H, W, Cout]
        cout = o_ref.shape[3]
        # Fully-unrolled row loop: H here is the /8 downsampled height (tiny),
        # and unrolling keeps everything visible to the LLO scheduler.
        # TODO(synk): for large H, move the row loop onto a grid axis.
        for y in range(H):
            acc = jnp.zeros((W, cout), jnp.float32)
            for i in range(kh):
                for j in range(kw):
                    acc = acc + jnp.dot(
                        x_ref[0, y + i, j:j + W, :], w_ref[i * kw + j],
                        preferred_element_type=jnp.float32)
            o_ref[0, y, :, :] = acc
    return kernel


def conv2d_pallas(x, w_taps, padding):
    """x: [B, H, W, Cin] channels-last; w_taps: [kh*kw, Cin, Cout] -> [B,H,W,Cout]."""
    B, H, W, Cin = x.shape
    n_taps, _, Cout = w_taps.shape
    kh = kw = int(round(math.sqrt(n_taps)))
    Cin_p = max(Cin, 8)
    Hp, Wp = H + 2 * padding, W + 2 * padding
    xp = jnp.zeros((B, Hp, Wp, Cin_p), jnp.bfloat16)
    xp = xp.at[:, padding:padding + H, padding:padding + W, :Cin].set(
        x.astype(jnp.bfloat16))
    wp = jnp.zeros((n_taps, Cin_p, Cout), jnp.bfloat16)
    wp = wp.at[:, :Cin, :].set(w_taps.astype(jnp.bfloat16))
    return pl.pallas_call(
        _make_conv_kernel(H, W, kh, kw),
        out_shape=jax.ShapeDtypeStruct((B, H, W, Cout), jnp.float32),
        grid=(B,),
        in_specs=[
            pl.BlockSpec((1, Hp, Wp, Cin_p), lambda b: (b, 0, 0, 0)),
            pl.BlockSpec((n_taps, Cin_p, Cout), lambda b: (0, 0, 0)),
        ],
        out_specs=pl.BlockSpec((1, H, W, Cout), lambda b: (b, 0, 0, 0)),
        compiler_params=pltpu.CompilerParams(dimension_semantics=("parallel",)),
    )(xp, wp)


# ----------------------------------------------------------------------------
# Pallas kernel 3: batched fused expert MLPs (generateKernel x 3 in one call):
#   leaky(x@w1+b1)@w2+b2 per selected expert, grid over the expert axis.
# ----------------------------------------------------------------------------
def _experts_mlp_kernel(x_ref, w1_ref, b1_ref, w2_ref, b2_ref, o_ref):
    h = jnp.dot(x_ref[0], w1_ref[0],
                preferred_element_type=jnp.float32) + b1_ref[0]
    h = jnp.where(h >= 0.0, h, 0.1 * h)                  # LeakyReLU(0.1)
    o_ref[0] = jnp.dot(h.astype(jnp.bfloat16), w2_ref[0],
                       preferred_element_type=jnp.float32) + b2_ref[0]


def experts_mlp_batched(x_chunks, w1s, b1s, w2s, b2s):
    """x_chunks: [E,M,K]; w1s: [E,K,H]; b1s: [E,H]; w2s: [E,H,N]; b2s: [E,N]."""
    E, M, K = x_chunks.shape
    H = w1s.shape[2]
    N = w2s.shape[2]
    Mp, Kp = _round_up(M, 16), _round_up(K, 128)
    Hp, Np = _round_up(H, 128), _round_up(N, 128)
    xp = jnp.zeros((E, Mp, Kp), jnp.bfloat16).at[:, :M, :K].set(
        x_chunks.astype(jnp.bfloat16))
    w1p = jnp.zeros((E, Kp, Hp), jnp.bfloat16).at[:, :K, :H].set(
        w1s.astype(jnp.bfloat16))
    b1p = jnp.zeros((E, 1, Hp), jnp.float32).at[:, 0, :H].set(b1s)
    w2p = jnp.zeros((E, Hp, Np), jnp.bfloat16).at[:, :H, :N].set(
        w2s.astype(jnp.bfloat16))
    b2p = jnp.zeros((E, 1, Np), jnp.float32).at[:, 0, :N].set(b2s)
    out = pl.pallas_call(
        _experts_mlp_kernel,
        out_shape=jax.ShapeDtypeStruct((E, Mp, Np), jnp.float32),
        grid=(E,),
        in_specs=[
            pl.BlockSpec((1, Mp, Kp), lambda e: (e, 0, 0)),
            pl.BlockSpec((1, Kp, Hp), lambda e: (e, 0, 0)),
            pl.BlockSpec((1, 1, Hp), lambda e: (e, 0, 0)),
            pl.BlockSpec((1, Hp, Np), lambda e: (e, 0, 0)),
            pl.BlockSpec((1, 1, Np), lambda e: (e, 0, 0)),
        ],
        out_specs=pl.BlockSpec((1, Mp, Np), lambda e: (e, 0, 0)),
        compiler_params=pltpu.CompilerParams(dimension_semantics=("parallel",)),
    )(xp, w1p, b1p, w2p, b2p)
    return out[:, :M, :N]


# ----------------------------------------------------------------------------
# Pallas kernel 4: fused DAB hot path (per-sample depthwise convs + LeakyReLU
# + folded 1x1 convs).  Output stored lane-dense ([B, H, round_up(W,128)]).
# ----------------------------------------------------------------------------
def _make_dab_kernel(ks_list, H, Wout, pmax):
    n_branch = len(ks_list)

    def kernel(x_ref, k0_ref, k1_ref, k2_ref, p_ref, o_ref):
        b = pl.program_id(0)
        krefs = (k0_ref, k1_ref, k2_ref)
        acc = jnp.zeros((H, Wout), jnp.float32)
        for d in range(n_branch):
            ks = ks_list[d]
            off = pmax - ks // 2
            kref = krefs[d]
            conv = jnp.zeros((H, Wout), jnp.float32)
            for i in range(ks):
                row = x_ref[0, off + i:off + i + H, :]           # [H, Wview]
                for j in range(ks):
                    c = off + j
                    conv = conv + row[:, c:c + Wout] * kref[b, i * ks + j]
            conv = jnp.where(conv >= 0.0, conv, 0.1 * conv)       # LeakyReLU(0.1)
            acc = acc + p_ref[d] * conv                           # final_w*dab_w[d]
        o_ref[0, :, :] = acc + p_ref[n_branch]                    # folded biases

    return kernel


def dab_fused(sr, kernels, ks_list, coefs, bias_total):
    """sr: [B,1,H,W]; kernels[d]: [B, ks_list[d]**2] per-sample depthwise taps."""
    B, C, H, W = sr.shape
    assert C == 1
    pmax = max(ks_list) // 2
    Wout = _round_up(W, 128)
    Wview = Wout + 2 * pmax
    Hp = H + 2 * pmax
    x = jnp.asarray(sr, jnp.float32)[:, 0]
    xpad = jnp.zeros((B, Hp, Wview), jnp.float32)
    xpad = xpad.at[:, pmax:pmax + H, pmax:pmax + W].set(x)
    pvec = jnp.stack([coefs[0], coefs[1], coefs[2], bias_total]).astype(jnp.float32)
    smem = pl.BlockSpec(memory_space=pltpu.MemorySpace.SMEM)
    out = pl.pallas_call(
        _make_dab_kernel(tuple(int(k) for k in ks_list), H, Wout, pmax),
        out_shape=jax.ShapeDtypeStruct((B, H, Wout), jnp.float32),
        grid=(B,),
        in_specs=[pl.BlockSpec((1, Hp, Wview), lambda bb: (bb, 0, 0)),
                  smem, smem, smem, smem],
        out_specs=pl.BlockSpec((1, H, Wout), lambda bb: (bb, 0, 0)),
        compiler_params=pltpu.CompilerParams(dimension_semantics=("parallel",)),
    )(xpad,
      jnp.asarray(kernels[0], jnp.float32),
      jnp.asarray(kernels[1], jnp.float32),
      jnp.asarray(kernels[2], jnp.float32),
      pvec)
    return out[:, None, :, :W]


# ----------------------------------------------------------------------------
# Plain-JAX glue: bicubic (align_corners=True), BN (train-mode stats), LeakyReLU
# ----------------------------------------------------------------------------
_A = -0.75


def _cw1(t):
    return ((_A + 2.0) * t - (_A + 3.0)) * t * t + 1.0


def _cw2(t):
    return ((_A * t - 5.0 * _A) * t + 8.0 * _A) * t - 4.0 * _A


def _resize_last_axis_bicubic_ac(x, out_size):
    in_size = x.shape[-1]
    if out_size > 1:
        src = jnp.arange(out_size, dtype=jnp.float32) * ((in_size - 1) / (out_size - 1))
    else:
        src = jnp.zeros((out_size,), jnp.float32)
    i0 = jnp.floor(src)
    t = src - i0
    idx = jnp.clip(i0.astype(jnp.int32)[:, None] + jnp.arange(-1, 3), 0, in_size - 1)
    w = jnp.stack([_cw2(t + 1.0), _cw1(t), _cw1(1.0 - t), _cw2(2.0 - t)], axis=-1)
    g = x[..., idx]
    return jnp.sum(g * w, axis=-1)


def bicubic_align_corners(x, out_h, out_w):
    y = _resize_last_axis_bicubic_ac(x, out_w)
    y = jnp.swapaxes(y, -1, -2)
    y = _resize_last_axis_bicubic_ac(y, out_h)
    return jnp.swapaxes(y, -1, -2)


def leaky_relu(x, slope=0.1):
    return jnp.where(x >= 0, x, slope * x)


def batchnorm_train(x, gamma, beta, eps=1e-5):
    # channels-last [B,H,W,C]; biased variance (PyTorch BN normalization).
    mean = jnp.mean(x, axis=(0, 1, 2), keepdims=True)
    var = jnp.var(x, axis=(0, 1, 2), keepdims=True)
    return gamma * (x - mean) * jax.lax.rsqrt(var + eps) + beta


def resblock(x, p):
    """x: [B,H,W,1] channels-last -> [B,H,W,nf]."""
    B, H, W, Cin = x.shape
    nf = p["bn1_g"].shape[0]
    h = conv2d_pallas(x, p["conv1_w"], padding=1)
    h = batchnorm_train(h, p["bn1_g"], p["bn1_b"])
    h = leaky_relu(h)
    h = conv2d_pallas(h, p["conv2_w"], padding=1)
    h = batchnorm_train(h, p["bn2_g"], p["bn2_b"])
    s = pallas_linear(x.reshape(B * H * W, Cin), p["convs_w"],
                      jnp.zeros((nf,), jnp.float32))          # 1x1 shortcut conv
    s = batchnorm_train(s.reshape(B, H, W, nf), p["bns_g"], p["bns_b"])
    return leaky_relu(h + s)


def _norm_cdf(z):
    return 0.5 * (1.0 + erf(z / math.sqrt(2.0)))


def _cv_squared(x):
    if x.shape[0] == 1:
        return jnp.zeros((), jnp.float32)
    return jnp.var(x, ddof=1) / (jnp.mean(x) ** 2 + 1e-10)


# ----------------------------------------------------------------------------
# Stage 1: features + noisy top-k gating + dispatcher bookkeeping (all device)
# ----------------------------------------------------------------------------
@jax.jit
def _stage1(lr, d_kernel, params, noise_key):
    B, _, H, W = lr.shape
    out_h, out_w = int(math.floor(H * 0.125)), int(math.floor(W * 0.125))
    y1 = bicubic_align_corners(jnp.asarray(lr, jnp.float32), out_h, out_w)
    y1 = jnp.transpose(y1, (0, 2, 3, 1))                        # channels-last
    y2 = resblock(y1, params["c1"])
    y3 = jnp.max(y2, axis=(1, 2)) + jnp.mean(y2, axis=(1, 2))    # gap + gap2
    y5 = pallas_linear(y3, params["fc1_w"], params["fc1_b"])

    moe = params["moe"]
    # single fused gating matmul: [clean_logits | raw_noise]
    w_gn = jnp.concatenate([moe["w_gate"], moe["w_noise"]], axis=1)
    logits2 = pallas_linear(y5, w_gn, jnp.zeros((2 * _NE,), jnp.float32))
    clean_logits = logits2[:, :_NE]
    raw_noise = logits2[:, _NE:]
    noise_std = jax.nn.softplus(raw_noise) + 0.01
    noise = jax.random.normal(noise_key, clean_logits.shape, jnp.float32)
    logits = clean_logits + noise * noise_std                   # noisy gating (train)

    m = min(_K + 1, _NE)
    top_logits, top_indices = jax.lax.top_k(logits, m)
    top_k_logits = top_logits[:, :_K]
    top_k_indices = top_indices[:, :_K]
    top_k_gates = jax.nn.softmax(top_k_logits, axis=1)
    gates = jnp.zeros((B, _NE), jnp.float32).at[
        jnp.arange(B)[:, None], top_k_indices].set(top_k_gates)

    # load via _prob_in_top_k (noisy gating, k < num_experts, training)
    thr_in = top_logits[:, _K][:, None]
    thr_out = top_logits[:, _K - 1][:, None]
    prob = jnp.where(logits > thr_in,
                     _norm_cdf((clean_logits - thr_in) / noise_std),
                     _norm_cdf((clean_logits - thr_out) / noise_std))
    load = prob.sum(0)
    importance = gates.sum(0)
    aux_loss = 0.02 * (_cv_squared(importance) + _cv_squared(load))

    # SparseDispatcher batch_index: nonzero-gate (batch, expert) pairs sorted by
    # expert then batch -- exactly B*_K entries, so static shapes throughout.
    b_idx = jnp.arange(B, dtype=jnp.int32)[:, None]
    e_idx = jnp.arange(_NE, dtype=jnp.int32)[None, :]
    sort_key = jnp.where(gates > 0, e_idx * B + b_idx, _NE * B).ravel()
    order = jnp.argsort(sort_key)
    batch_index = sort_key[order[:B * _K]] % B
    d_exp = jnp.asarray(d_kernel, jnp.float32)[batch_index]      # [B*k, 4*nf]

    index_1 = top_k_indices[0]                                   # experts of sample 0
    return d_exp, index_1, aux_loss


# ----------------------------------------------------------------------------
# Stage 2: expert MLPs (one batched kernel) + fused DAB (static structure `sel`)
# ----------------------------------------------------------------------------
@partial(jax.jit, static_argnames=("sel",))
def _stage2(sr, d_exp, params, *, sel):
    B = sr.shape[0]
    moe = params["moe"]

    # dispatch() quirk: the d-th selected expert (in increasing expert-id
    # order) receives rows [B*d, B*(d+1)) of the expert-sorted D_Kernel gather.
    # Chunks are always exactly B rows, so the DAB never sees an empty chunk.
    nf4 = d_exp.shape[1]
    x_chunks = d_exp.reshape(_K, B, nf4)                          # [3, B, 4*nf]

    hid = moe["experts"][sel[0]]["w1"].shape[1]
    n_max = max(_EXPERT_KS[e] ** 2 for e in sel)
    w1s = jnp.stack([moe["experts"][e]["w1"] for e in sel])
    b1s = jnp.stack([moe["experts"][e]["b1"] for e in sel])
    w2s, b2s = [], []
    for e in sel:
        w2 = moe["experts"][e]["w2"]
        b2 = moe["experts"][e]["b2"]
        n = w2.shape[1]
        w2s.append(jnp.zeros((hid, n_max), jnp.float32).at[:, :n].set(w2))
        b2s.append(jnp.zeros((n_max,), jnp.float32).at[:n].set(b2))
    w2s = jnp.stack(w2s)
    b2s = jnp.stack(b2s)

    kouts = experts_mlp_batched(x_chunks, w1s, b1s, w2s, b2s)     # [3, B, n_max]
    kernels = [kouts[d, :, :_EXPERT_KS[e] ** 2] for d, e in enumerate(sel)]
    ks_list = tuple(_EXPERT_KS[e] for e in sel)

    # Fold the three DAB 1x1 convs and the final 1x1 conv (exact):
    #   final_w*(dab_w[d]*leaky(conv_d) + dab_b[d]) + final_b
    # = (final_w*dab_w[d])*leaky(conv_d)  +  [final_w*sum(dab_b) + final_b]
    coefs = [params["final_w"] * params["dab_w"][d] for d in range(3)]
    bias_total = (params["final_w"]
                  * (params["dab_b"][0] + params["dab_b"][1] + params["dab_b"][2])
                  + params["final_b"])
    return dab_fused(sr, kernels, ks_list, coefs, bias_total)


def dr_forward(lr, sr, d_kernel, params, noise_key, num_experts=4, k=3):
    assert num_experts == _NE and k == _K
    d_exp, index_1, aux_loss = _stage1(lr, d_kernel, params, noise_key)
    # TODO(synk): the only remaining host sync -- the k chosen expert ids of
    # batch element 0 fix the *static* DAB kernel sizes.  A fully on-device
    # alternative is a 4-way lax.switch over the excluded expert.
    sel = tuple(sorted(int(v) for v in jax.device_get(index_1)))
    out = _stage2(sr, d_exp, params, sel=sel)
    return out, aux_loss


# ----------------------------------------------------------------------------
# Deterministic parameter init (weights pre-arranged in kernel-friendly layouts)
# ----------------------------------------------------------------------------
def init_params(nfeats, key):
    ks = jax.random.split(key, 16)
    nf = nfeats

    def nrm(kk, shape, scale):
        return scale * jax.random.normal(kk, shape, jnp.float32)

    p = {}
    p["c1"] = dict(
        conv1_w=nrm(ks[0], (9, 1, nf), 0.3),          # [kh*kw, Cin, Cout]
        bn1_g=jnp.ones((nf,), jnp.float32), bn1_b=jnp.zeros((nf,), jnp.float32),
        conv2_w=nrm(ks[1], (9, nf, nf), 0.1),
        bn2_g=jnp.ones((nf,), jnp.float32), bn2_b=jnp.zeros((nf,), jnp.float32),
        convs_w=nrm(ks[2], (1, nf), 0.3),             # 1x1 shortcut as [Cin, Cout]
        bns_g=jnp.ones((nf,), jnp.float32), bns_b=jnp.zeros((nf,), jnp.float32),
    )
    p["fc1_w"] = nrm(ks[3], (nf, 4 * nf), 1.0 / math.sqrt(nf))   # [K, N]
    p["fc1_b"] = nrm(ks[4], (4 * nf,), 0.01)
    experts = []
    for i in range(4):
        experts.append(dict(
            w1=nrm(ks[5 + i], (4 * nf, nf), 1.0 / math.sqrt(4 * nf)),
            b1=jnp.zeros((nf,), jnp.float32),
            w2=nrm(ks[9 + i], (nf, _EXPERT_KS[i] ** 2), 1.0 / math.sqrt(nf)),
            b2=jnp.zeros((_EXPERT_KS[i] ** 2,), jnp.float32),
        ))
    p["moe"] = dict(
        w_gate=jnp.zeros((4 * nf, _NE), jnp.float32),   # matches torch.zeros init
        w_noise=jnp.zeros((4 * nf, _NE), jnp.float32),
        experts=experts,
    )
    p["dab_w"] = (0.9, 1.1, 1.0)       # the three DAB 1x1-conv weights (scalars)
    p["dab_b"] = (0.01, -0.02, 0.03)
    p["final_w"] = 0.8                 # DR final 1x1 conv
    p["final_b"] = 0.05
    return p


if __name__ == "__main__":
    nfeats = 32
    B, H, W = 2, 16, 16
    key = jax.random.PRNGKey(0)
    k_lr, k_sr, k_dk, k_par, k_noise = jax.random.split(key, 5)

    lr = jax.random.normal(k_lr, (B, 1, H, W), jnp.float32)
    sr = jax.random.normal(k_sr, (B, 1, H, W), jnp.float32)
    d_kernel = 0.1 * jax.random.normal(k_dk, (B, 4 * nfeats), jnp.float32)
    params = init_params(nfeats, k_par)

    out, aux_loss = dr_forward(lr, sr, d_kernel, params, k_noise)
    out = jax.block_until_ready(out)

    assert out.shape == (B, 1, H, W)
    assert bool(jnp.all(jnp.isfinite(out)))
    assert bool(jnp.isfinite(aux_loss))
    print("KERNEL_OK")
</pallas_src>

<mosaic_0001>
module attributes {stable_mosaic.version = 11 : i64} {
  func.func @kernel(%arg0: i32, %arg1: memref<1x4x4x8xbf16, #tpu.memory_space<vmem>>, %arg2: memref<9x8x32xbf16, #tpu.memory_space<vmem>>, %arg3: memref<1x2x2x32xf32, #tpu.memory_space<vmem>>) attributes {dimension_semantics = [#tpu.dimension_semantics<parallel>], iteration_bounds = array<i64: 2>, scalar_prefetch = 0 : i64, scratch_operands = 0 : i64, tpu.core_type = #tpu.core_type<tc>, window_params = [{transform_indices = @transform_0, window_bounds = array<i64: 1, 4, 4, 8>}, {pipeline_mode = #tpu.pipeline_mode<synchronous>, transform_indices = @transform_1, window_bounds = array<i64: 9, 8, 32>}, {transform_indices = @transform_2, window_bounds = array<i64: 1, 2, 2, 32>}]} {
    %cst = arith.constant 0.000000e+00 : f32
    %0 = vector.broadcast %cst : f32 to vector<2x32xf32>
    %c0 = arith.constant 0 : index
    %c0_0 = arith.constant 0 : index
    %c0_1 = arith.constant 0 : index
    %c0_2 = arith.constant 0 : index
    %1 = vector.load %arg1[%c0, %c0_0, %c0_1, %c0_2] : memref<1x4x4x8xbf16, #tpu.memory_space<vmem>>, vector<1x1x2x8xbf16>
    %2 = vector.shape_cast %1 : vector<1x1x2x8xbf16> to vector<2x8xbf16>
    %c0_3 = arith.constant 0 : index
    %c0_4 = arith.constant 0 : index
    %c0_5 = arith.constant 0 : index
    %3 = vector.load %arg2[%c0_3, %c0_4, %c0_5] : memref<9x8x32xbf16, #tpu.memory_space<vmem>>, vector<1x8x32xbf16>
    %4 = vector.shape_cast %3 : vector<1x8x32xbf16> to vector<8x32xbf16>
    %cst_6 = arith.constant dense<0.000000e+00> : vector<2x32xf32>
    %5 = tpu.matmul %2, %4, %cst_6 {dimension_numbers = #tpu.dot_dimension_numbers<[1], [0], [0], [1], [0, 0, 1, 1], [], []>} : vector<2x8xbf16>, vector<8x32xbf16>, vector<2x32xf32> -> vector<2x32xf32>
    %6 = arith.addf %0, %5 : vector<2x32xf32>
    %c0_7 = arith.constant 0 : index
    %c0_8 = arith.constant 0 : index
    %c1 = arith.constant 1 : index
    %c0_9 = arith.constant 0 : index
    %7 = vector.load %arg1[%c0_7, %c0_8, %c1, %c0_9] : memref<1x4x4x8xbf16, #tpu.memory_space<vmem>>, vector<1x1x2x8xbf16>
    %8 = vector.shape_cast %7 : vector<1x1x2x8xbf16> to vector<2x8xbf16>
    %c1_10 = arith.constant 1 : index
    %c0_11 = arith.constant 0 : index
    %c0_12 = arith.constant 0 : index
    %9 = vector.load %arg2[%c1_10, %c0_11, %c0_12] : memref<9x8x32xbf16, #tpu.memory_space<vmem>>, vector<1x8x32xbf16>
    %10 = vector.shape_cast %9 : vector<1x8x32xbf16> to vector<8x32xbf16>
    %cst_13 = arith.constant dense<0.000000e+00> : vector<2x32xf32>
    %11 = tpu.matmul %8, %10, %cst_13 {dimension_numbers = #tpu.dot_dimension_numbers<[1], [0], [0], [1], [0, 0, 1, 1], [], []>} : vector<2x8xbf16>, vector<8x32xbf16>, vector<2x32xf32> -> vector<2x32xf32>
    %12 = arith.addf %6, %11 : vector<2x32xf32>
    %c0_14 = arith.constant 0 : index
    %c0_15 = arith.constant 0 : index
    %c2 = arith.constant 2 : index
    %c0_16 = arith.constant 0 : index
    %13 = vector.load %arg1[%c0_14, %c0_15, %c2, %c0_16] : memref<1x4x4x8xbf16, #tpu.memory_space<vmem>>, vector<1x1x2x8xbf16>
    %14 = vector.shape_cast %13 : vector<1x1x2x8xbf16> to vector<2x8xbf16>
    %c2_17 = arith.constant 2 : index
    %c0_18 = arith.constant 0 : index
    %c0_19 = arith.constant 0 : index
    %15 = vector.load %arg2[%c2_17, %c0_18, %c0_19] : memref<9x8x32xbf16, #tpu.memory_space<vmem>>, vector<1x8x32xbf16>
    %16 = vector.shape_cast %15 : vector<1x8x32xbf16> to vector<8x32xbf16>
    %cst_20 = arith.constant dense<0.000000e+00> : vector<2x32xf32>
    %17 = tpu.matmul %14, %16, %cst_20 {dimension_numbers = #tpu.dot_dimension_numbers<[1], [0], [0], [1], [0, 0, 1, 1], [], []>} : vector<2x8xbf16>, vector<8x32xbf16>, vector<2x32xf32> -> vector<2x32xf32>
    %18 = arith.addf %12, %17 : vector<2x32xf32>
    %c0_21 = arith.constant 0 : index
    %c1_22 = arith.constant 1 : index
    %c0_23 = arith.constant 0 : index
    %c0_24 = arith.constant 0 : index
    %19 = vector.load %arg1[%c0_21, %c1_22, %c0_23, %c0_24] : memref<1x4x4x8xbf16, #tpu.memory_space<vmem>>, vector<1x1x2x8xbf16>
    %20 = vector.shape_cast %19 : vector<1x1x2x8xbf16> to vector<2x8xbf16>
    %c3 = arith.constant 3 : index
    %c0_25 = arith.constant 0 : index
    %c0_26 = arith.constant 0 : index
    %21 = vector.load %arg2[%c3, %c0_25, %c0_26] : memref<9x8x32xbf16, #tpu.memory_space<vmem>>, vector<1x8x32xbf16>
    %22 = vector.shape_cast %21 : vector<1x8x32xbf16> to vector<8x32xbf16>
    %cst_27 = arith.constant dense<0.000000e+00> : vector<2x32xf32>
    %23 = tpu.matmul %20, %22, %cst_27 {dimension_numbers = #tpu.dot_dimension_numbers<[1], [0], [0], [1], [0, 0, 1, 1], [], []>} : vector<2x8xbf16>, vector<8x32xbf16>, vector<2x32xf32> -> vector<2x32xf32>
    %24 = arith.addf %18, %23 : vector<2x32xf32>
    %c0_28 = arith.constant 0 : index
    %c1_29 = arith.constant 1 : index
    %c1_30 = arith.constant 1 : index
    %c0_31 = arith.constant 0 : index
    %25 = vector.load %arg1[%c0_28, %c1_29, %c1_30, %c0_31] : memref<1x4x4x8xbf16, #tpu.memory_space<vmem>>, vector<1x1x2x8xbf16>
    %26 = vector.shape_cast %25 : vector<1x1x2x8xbf16> to vector<2x8xbf16>
    %c4 = arith.constant 4 : index
    %c0_32 = arith.constant 0 : index
    %c0_33 = arith.constant 0 : index
    %27 = vector.load %arg2[%c4, %c0_32, %c0_33] : memref<9x8x32xbf16, #tpu.memory_space<vmem>>, vector<1x8x32xbf16>
    %28 = vector.shape_cast %27 : vector<1x8x32xbf16> to vector<8x32xbf16>
    %cst_34 = arith.constant dense<0.000000e+00> : vector<2x32xf32>
    %29 = tpu.matmul %26, %28, %cst_34 {dimension_numbers = #tpu.dot_dimension_numbers<[1], [0], [0], [1], [0, 0, 1, 1], [], []>} : vector<2x8xbf16>, vector<8x32xbf16>, vector<2x32xf32> -> vector<2x32xf32>
    %30 = arith.addf %24, %29 : vector<2x32xf32>
    %c0_35 = arith.constant 0 : index
    %c1_36 = arith.constant 1 : index
    %c2_37 = arith.constant 2 : index
    %c0_38 = arith.constant 0 : index
    %31 = vector.load %arg1[%c0_35, %c1_36, %c2_37, %c0_38] : memref<1x4x4x8xbf16, #tpu.memory_space<vmem>>, vector<1x1x2x8xbf16>
    %32 = vector.shape_cast %31 : vector<1x1x2x8xbf16> to vector<2x8xbf16>
    %c5 = arith.constant 5 : index
    %c0_39 = arith.constant 0 : index
    %c0_40 = arith.constant 0 : index
    %33 = vector.load %arg2[%c5, %c0_39, %c0_40] : memref<9x8x32xbf16, #tpu.memory_space<vmem>>, vector<1x8x32xbf16>
    %34 = vector.shape_cast %33 : vector<1x8x32xbf16> to vector<8x32xbf16>
    %cst_41 = arith.constant dense<0.000000e+00> : vector<2x32xf32>
    %35 = tpu.matmul %32, %34, %cst_41 {dimension_numbers = #tpu.dot_dimension_numbers<[1], [0], [0], [1], [0, 0, 1, 1], [], []>} : vector<2x8xbf16>, vector<8x32xbf16>, vector<2x32xf32> -> vector<2x32xf32>
    %36 = arith.addf %30, %35 : vector<2x32xf32>
    %c0_42 = arith.constant 0 : index
    %c2_43 = arith.constant 2 : index
    %c0_44 = arith.constant 0 : index
    %c0_45 = arith.constant 0 : index
    %37 = vector.load %arg1[%c0_42, %c2_43, %c0_44, %c0_45] : memref<1x4x4x8xbf16, #tpu.memory_space<vmem>>, vector<1x1x2x8xbf16>
    %38 = vector.shape_cast %37 : vector<1x1x2x8xbf16> to vector<2x8xbf16>
    %c6 = arith.constant 6 : index
    %c0_46 = arith.constant 0 : index
    %c0_47 = arith.constant 0 : index
    %39 = vector.load %arg2[%c6, %c0_46, %c0_47] : memref<9x8x32xbf16, #tpu.memory_space<vmem>>, vector<1x8x32xbf16>
    %40 = vector.shape_cast %39 : vector<1x8x32xbf16> to vector<8x32xbf16>
    %cst_48 = arith.constant dense<0.000000e+00> : vector<2x32xf32>
    %41 = tpu.matmul %38, %40, %cst_48 {dimension_numbers = #tpu.dot_dimension_numbers<[1], [0], [0], [1], [0, 0, 1, 1], [], []>} : vector<2x8xbf16>, vector<8x32xbf16>, vector<2x32xf32> -> vector<2x32xf32>
    %42 = arith.addf %36, %41 : vector<2x32xf32>
    %c0_49 = arith.constant 0 : index
    %c2_50 = arith.constant 2 : index
    %c1_51 = arith.constant 1 : index
    %c0_52 = arith.constant 0 : index
    %43 = vector.load %arg1[%c0_49, %c2_50, %c1_51, %c0_52] : memref<1x4x4x8xbf16, #tpu.memory_space<vmem>>, vector<1x1x2x8xbf16>
    %44 = vector.shape_cast %43 : vector<1x1x2x8xbf16> to vector<2x8xbf16>
    %c7 = arith.constant 7 : index
    %c0_53 = arith.constant 0 : index
    %c0_54 = arith.constant 0 : index
    %45 = vector.load %arg2[%c7, %c0_53, %c0_54] : memref<9x8x32xbf16, #tpu.memory_space<vmem>>, vector<1x8x32xbf16>
    %46 = vector.shape_cast %45 : vector<1x8x32xbf16> to vector<8x32xbf16>
    %cst_55 = arith.constant dense<0.000000e+00> : vector<2x32xf32>
    %47 = tpu.matmul %44, %46, %cst_55 {dimension_numbers = #tpu.dot_dimension_numbers<[1], [0], [0], [1], [0, 0, 1, 1], [], []>} : vector<2x8xbf16>, vector<8x32xbf16>, vector<2x32xf32> -> vector<2x32xf32>
    %48 = arith.addf %42, %47 : vector<2x32xf32>
    %c0_56 = arith.constant 0 : index
    %c2_57 = arith.constant 2 : index
    %c2_58 = arith.constant 2 : index
    %c0_59 = arith.constant 0 : index
    %49 = vector.load %arg1[%c0_56, %c2_57, %c2_58, %c0_59] : memref<1x4x4x8xbf16, #tpu.memory_space<vmem>>, vector<1x1x2x8xbf16>
    %50 = vector.shape_cast %49 : vector<1x1x2x8xbf16> to vector<2x8xbf16>
    %c8 = arith.constant 8 : index
    %c0_60 = arith.constant 0 : index
    %c0_61 = arith.constant 0 : index
    %51 = vector.load %arg2[%c8, %c0_60, %c0_61] : memref<9x8x32xbf16, #tpu.memory_space<vmem>>, vector<1x8x32xbf16>
    %52 = vector.shape_cast %51 : vector<1x8x32xbf16> to vector<8x32xbf16>
    %cst_62 = arith.constant dense<0.000000e+00> : vector<2x32xf32>
    %53 = tpu.matmul %50, %52, %cst_62 {dimension_numbers = #tpu.dot_dimension_numbers<[1], [0], [0], [1], [0, 0, 1, 1], [], []>} : vector<2x8xbf16>, vector<8x32xbf16>, vector<2x32xf32> -> vector<2x32xf32>
    %54 = arith.addf %48, %53 : vector<2x32xf32>
    %c0_63 = arith.constant 0 : index
    %c0_64 = arith.constant 0 : index
    %c0_65 = arith.constant 0 : index
    %c0_66 = arith.constant 0 : index
    %55 = vector.load %arg3[%c0_63, %c0_64, %c0_65, %c0_66] : memref<1x2x2x32xf32, #tpu.memory_space<vmem>>, vector<1x1x2x32xf32>
    %56 = vector.shape_cast %55 : vector<1x1x2x32xf32> to vector<2x32xf32>
    %57 = vector.shape_cast %54 : vector<2x32xf32> to vector<1x1x2x32xf32>
    tpu.vector_store %arg3[%c0_63, %c0_64, %c0_65, %c0_66], %57 {strides = array<i32>} : memref<1x2x2x32xf32, #tpu.memory_space<vmem>>, vector<1x1x2x32xf32>,
    %cst_67 = arith.constant 0.000000e+00 : f32
    %58 = vector.broadcast %cst_67 : f32 to vector<2x32xf32>
    %c0_68 = arith.constant 0 : index
    %c1_69 = arith.constant 1 : index
    %c0_70 = arith.constant 0 : index
    %c0_71 = arith.constant 0 : index
    %59 = vector.load %arg1[%c0_68, %c1_69, %c0_70, %c0_71] : memref<1x4x4x8xbf16, #tpu.memory_space<vmem>>, vector<1x1x2x8xbf16>
    %60 = vector.shape_cast %59 : vector<1x1x2x8xbf16> to vector<2x8xbf16>
    %c0_72 = arith.constant 0 : index
    %c0_73 = arith.constant 0 : index
    %c0_74 = arith.constant 0 : index
    %61 = vector.load %arg2[%c0_72, %c0_73, %c0_74] : memref<9x8x32xbf16, #tpu.memory_space<vmem>>, vector<1x8x32xbf16>
    %62 = vector.shape_cast %61 : vector<1x8x32xbf16> to vector<8x32xbf16>
    %cst_75 = arith.constant dense<0.000000e+00> : vector<2x32xf32>
    %63 = tpu.matmul %60, %62, %cst_75 {dimension_numbers = #tpu.dot_dimension_numbers<[1], [0], [0], [1], [0, 0, 1, 1], [], []>} : vector<2x8xbf16>, vector<8x32xbf16>, vector<2x32xf32> -> vector<2x32xf32>
    %64 = arith.addf %58, %63 : vector<2x32xf32>
    %c0_76 = arith.constant 0 : index
    %c1_77 = arith.constant 1 : index
    %c1_78 = arith.constant 1 : index
    %c0_79 = arith.constant 0 : index
    %65 = vector.load %arg1[%c0_76, %c1_77, %c1_78, %c0_79] : memref<1x4x4x8xbf16, #tpu.memory_space<vmem>>, vector<1x1x2x8xbf16>
    %66 = vector.shape_cast %65 : vector<1x1x2x8xbf16> to vector<2x8xbf16>
    %c1_80 = arith.constant 1 : index
    %c0_81 = arith.constant 0 : index
    %c0_82 = arith.constant 0 : index
    %67 = vector.load %arg2[%c1_80, %c0_81, %c0_82] : memref<9x8x32xbf16, #tpu.memory_space<vmem>>, vector<1x8x32xbf16>
    %68 = vector.shape_cast %67 : vector<1x8x32xbf16> to vector<8x32xbf16>
    %cst_83 = arith.constant dense<0.000000e+00> : vector<2x32xf32>
    %69 = tpu.matmul %66, %68, %cst_83 {dimension_numbers = #tpu.dot_dimension_numbers<[1], [0], [0], [1], [0, 0, 1, 1], [], []>} : vector<2x8xbf16>, vector<8x32xbf16>, vector<2x32xf32> -> vector<2x32xf32>
    %70 = arith.addf %64, %69 : vector<2x32xf32>
    %c0_84 = arith.constant 0 : index
    %c1_85 = arith.constant 1 : index
    %c2_86 = arith.constant 2 : index
    %c0_87 = arith.constant 0 : index
    %71 = vector.load %arg1[%c0_84, %c1_85, %c2_86, %c0_87] : memref<1x4x4x8xbf16, #tpu.memory_space<vmem>>, vector<1x1x2x8xbf16>
    %72 = vector.shape_cast %71 : vector<1x1x2x8xbf16> to vector<2x8xbf16>
    %c2_88 = arith.constant 2 : index
    %c0_89 = arith.constant 0 : index
    %c0_90 = arith.constant 0 : index
    %73 = vector.load %arg2[%c2_88, %c0_89, %c0_90] : memref<9x8x32xbf16, #tpu.memory_space<vmem>>, vector<1x8x32xbf16>
    %74 = vector.shape_cast %73 : vector<1x8x32xbf16> to vector<8x32xbf16>
    %cst_91 = arith.constant dense<0.000000e+00> : vector<2x32xf32>
    %75 = tpu.matmul %72, %74, %cst_91 {dimension_numbers = #tpu.dot_dimension_numbers<[1], [0], [0], [1], [0, 0, 1, 1], [], []>} : vector<2x8xbf16>, vector<8x32xbf16>, vector<2x32xf32> -> vector<2x32xf32>
    %76 = arith.addf %70, %75 : vector<2x32xf32>
    %c0_92 = arith.constant 0 : index
    %c2_93 = arith.constant 2 : index
    %c0_94 = arith.constant 0 : index
    %c0_95 = arith.constant 0 : index
    %77 = vector.load %arg1[%c0_92, %c2_93, %c0_94, %c0_95] : memref<1x4x4x8xbf16, #tpu.memory_space<vmem>>, vector<1x1x2x8xbf16>
    %78 = vector.shape_cast %77 : vector<1x1x2x8xbf16> to vector<2x8xbf16>
    %c3_96 = arith.constant 3 : index
    %c0_97 = arith.constant 0 : index
    %c0_98 = arith.constant 0 : index
    %79 = vector.load %arg2[%c3_96, %c0_97, %c0_98] : memref<9x8x32xbf16, #tpu.memory_space<vmem>>, vector<1x8x32xbf16>
    %80 = vector.shape_cast %79 : vector<1x8x32xbf16> to vector<8x32xbf16>
    %cst_99 = arith.constant dense<0.000000e+00> : vector<2x32xf32>
    %81 = tpu.matmul %78, %80, %cst_99 {dimension_numbers = #tpu.dot_dimension_numbers<[1], [0], [0], [1], [0, 0, 1, 1], [], []>} : vector<2x8xbf16>, vector<8x32xbf16>, vector<2x32xf32> -> vector<2x32xf32>
    %82 = arith.addf %76, %81 : vector<2x32xf32>
    %c0_100 = arith.constant 0 : index
    %c2_101 = arith.constant 2 : index
    %c1_102 = arith.constant 1 : index
    %c0_103 = arith.constant 0 : index
    %83 = vector.load %arg1[%c0_100, %c2_101, %c1_102, %c0_103] : memref<1x4x4x8xbf16, #tpu.memory_space<vmem>>, vector<1x1x2x8xbf16>
    %84 = vector.shape_cast %83 : vector<1x1x2x8xbf16> to vector<2x8xbf16>
    %c4_104 = arith.constant 4 : index
    %c0_105 = arith.constant 0 : index
    %c0_106 = arith.constant 0 : index
    %85 = vector.load %arg2[%c4_104, %c0_105, %c0_106] : memref<9x8x32xbf16, #tpu.memory_space<vmem>>, vector<1x8x32xbf16>
    %86 = vector.shape_cast %85 : vector<1x8x32xbf16> to vector<8x32xbf16>
    %cst_107 = arith.constant dense<0.000000e+00> : vector<2x32xf32>
    %87 = tpu.matmul %84, %86, %cst_107 {dimension_numbers = #tpu.dot_dimension_numbers<[1], [0], [0], [1], [0, 0, 1, 1], [], []>} : vector<2x8xbf16>, vector<8x32xbf16>, vector<2x32xf32> -> vector<2x32xf32>
    %88 = arith.addf %82, %87 : vector<2x32xf32>
    %c0_108 = arith.constant 0 : index
    %c2_109 = arith.constant 2 : index
    %c2_110 = arith.constant 2 : index
    %c0_111 = arith.constant 0 : index
    %89 = vector.load %arg1[%c0_108, %c2_109, %c2_110, %c0_111] : memref<1x4x4x8xbf16, #tpu.memory_space<vmem>>, vector<1x1x2x8xbf16>
    %90 = vector.shape_cast %89 : vector<1x1x2x8xbf16> to vector<2x8xbf16>
    %c5_112 = arith.constant 5 : index
    %c0_113 = arith.constant 0 : index
    %c0_114 = arith.constant 0 : index
    %91 = vector.load %arg2[%c5_112, %c0_113, %c0_114] : memref<9x8x32xbf16, #tpu.memory_space<vmem>>, vector<1x8x32xbf16>
    %92 = vector.shape_cast %91 : vector<1x8x32xbf16> to vector<8x32xbf16>
    %cst_115 = arith.constant dense<0.000000e+00> : vector<2x32xf32>
    %93 = tpu.matmul %90, %92, %cst_115 {dimension_numbers = #tpu.dot_dimension_numbers<[1], [0], [0], [1], [0, 0, 1, 1], [], []>} : vector<2x8xbf16>, vector<8x32xbf16>, vector<2x32xf32> -> vector<2x32xf32>
    %94 = arith.addf %88, %93 : vector<2x32xf32>
    %c0_116 = arith.constant 0 : index
    %c3_117 = arith.constant 3 : index
    %c0_118 = arith.constant 0 : index
    %c0_119 = arith.constant 0 : index
    %95 = vector.load %arg1[%c0_116, %c3_117, %c0_118, %c0_119] : memref<1x4x4x8xbf16, #tpu.memory_space<vmem>>, vector<1x1x2x8xbf16>
    %96 = vector.shape_cast %95 : vector<1x1x2x8xbf16> to vector<2x8xbf16>
    %c6_120 = arith.constant 6 : index
    %c0_121 = arith.constant 0 : index
    %c0_122 = arith.constant 0 : index
    %97 = vector.load %arg2[%c6_120, %c0_121, %c0_122] : memref<9x8x32xbf16, #tpu.memory_space<vmem>>, vector<1x8x32xbf16>
    %98 = vector.shape_cast %97 : vector<1x8x32xbf16> to vector<8x32xbf16>
    %cst_123 = arith.constant dense<0.000000e+00> : vector<2x32xf32>
    %99 = tpu.matmul %96, %98, %cst_123 {dimension_numbers = #tpu.dot_dimension_numbers<[1], [0], [0], [1], [0, 0, 1, 1], [], []>} : vector<2x8xbf16>, vector<8x32xbf16>, vector<2x32xf32> -> vector<2x32xf32>
    %100 = arith.addf %94, %99 : vector<2x32xf32>
    %c0_124 = arith.constant 0 : index
    %c3_125 = arith.constant 3 : index
    %c1_126 = arith.constant 1 : index
    %c0_127 = arith.constant 0 : index
    %101 = vector.load %arg1[%c0_124, %c3_125, %c1_126, %c0_127] : memref<1x4x4x8xbf16, #tpu.memory_space<vmem>>, vector<1x1x2x8xbf16>
    %102 = vector.shape_cast %101 : vector<1x1x2x8xbf16> to vector<2x8xbf16>
    %c7_128 = arith.constant 7 : index
    %c0_129 = arith.constant 0 : index
    %c0_130 = arith.constant 0 : index
    %103 = vector.load %arg2[%c7_128, %c0_129, %c0_130] : memref<9x8x32xbf16, #tpu.memory_space<vmem>>, vector<1x8x32xbf16>
    %104 = vector.shape_cast %103 : vector<1x8x32xbf16> to vector<8x32xbf16>
    %cst_131 = arith.constant dense<0.000000e+00> : vector<2x32xf32>
    %105 = tpu.matmul %102, %104, %cst_131 {dimension_numbers = #tpu.dot_dimension_numbers<[1], [0], [0], [1], [0, 0, 1, 1], [], []>} : vector<2x8xbf16>, vector<8x32xbf16>, vector<2x32xf32> -> vector<2x32xf32>
    %106 = arith.addf %100, %105 : vector<2x32xf32>
    %c0_132 = arith.constant 0 : index
    %c3_133 = arith.constant 3 : index
    %c2_134 = arith.constant 2 : index
    %c0_135 = arith.constant 0 : index
    %107 = vector.load %arg1[%c0_132, %c3_133, %c2_134, %c0_135] : memref<1x4x4x8xbf16, #tpu.memory_space<vmem>>, vector<1x1x2x8xbf16>
    %108 = vector.shape_cast %107 : vector<1x1x2x8xbf16> to vector<2x8xbf16>
    %c8_136 = arith.constant 8 : index
    %c0_137 = arith.constant 0 : index
    %c0_138 = arith.constant 0 : index
    %109 = vector.load %arg2[%c8_136, %c0_137, %c0_138] : memref<9x8x32xbf16, #tpu.memory_space<vmem>>, vector<1x8x32xbf16>
    %110 = vector.shape_cast %109 : vector<1x8x32xbf16> to vector<8x32xbf16>
    %cst_139 = arith.constant dense<0.000000e+00> : vector<2x32xf32>
    %111 = tpu.matmul %108, %110, %cst_139 {dimension_numbers = #tpu.dot_dimension_numbers<[1], [0], [0], [1], [0, 0, 1, 1], [], []>} : vector<2x8xbf16>, vector<8x32xbf16>, vector<2x32xf32> -> vector<2x32xf32>
    %112 = arith.addf %106, %111 : vector<2x32xf32>
    %c0_140 = arith.constant 0 : index
    %c1_141 = arith.constant 1 : index
    %c0_142 = arith.constant 0 : index
    %c0_143 = arith.constant 0 : index
    %113 = vector.load %arg3[%c0_140, %c1_141, %c0_142, %c0_143] : memref<1x2x2x32xf32, #tpu.memory_space<vmem>>, vector<1x1x2x32xf32>
    %114 = vector.shape_cast %113 : vector<1x1x2x32xf32> to vector<2x32xf32>
    %115 = vector.shape_cast %112 : vector<2x32xf32> to vector<1x1x2x32xf32>
    tpu.vector_store %arg3[%c0_140, %c1_141, %c0_142, %c0_143], %115 {strides = array<i32>} : memref<1x2x2x32xf32, #tpu.memory_space<vmem>>, vector<1x1x2x32xf32>,
    return
  }
  func.func @transform_0(%arg0: i32) -> (i32, i32, i32, i32) {
    %c0_i32 = arith.constant 0 : i32
    %c0_i32_0 = arith.constant 0 : i32
    %c0_i32_1 = arith.constant 0 : i32
    %c0_i32_2 = arith.constant 0 : i32
    return %arg0, %c0_i32, %c0_i32_0, %c0_i32_1 : i32, i32, i32, i32
  }
  func.func @transform_1(%arg0: i32) -> (i32, i32, i32) {
    %c0_i32 = arith.constant 0 : i32
    %c0_i32_0 = arith.constant 0 : i32
    %c0_i32_1 = arith.constant 0 : i32
    %c0_i32_2 = arith.constant 0 : i32
    return %c0_i32, %c0_i32_0, %c0_i32_1 : i32, i32, i32
  }
  func.func @transform_2(%arg0: i32) -> (i32, i32, i32, i32) {
    %c0_i32 = arith.constant 0 : i32
    %c0_i32_0 = arith.constant 0 : i32
    %c0_i32_1 = arith.constant 0 : i32
    %c0_i32_2 = arith.constant 0 : i32
    return %arg0, %c0_i32, %c0_i32_0, %c0_i32_1 : i32, i32, i32, i32
  }
}

module attributes {stable_mosaic.version = 11 : i64} {
  func.func @_linear_kernel(%arg0: i32, %arg1: i32, %arg2: i32, %arg3: memref<16x128xbf16, #tpu.memory_space<vmem>>, %arg4: memref<128x128xbf16, #tpu.memory_space<vmem>>, %arg5: memref<1x128xf32, #tpu.memory_space<vmem>>, %arg6: memref<16x128xf32, #tpu.memory_space<vmem>>, %arg7: memref<16x128xf32, #tpu.memory_space<vmem>>) attributes {dimension_semantics = [#tpu.dimension_semantics<parallel>, #tpu.dimension_semantics<parallel>, #tpu.dimension_semantics<arbitrary>], iteration_bounds = array<i64: 1, 1, 1>, scalar_prefetch = 0 : i64, scratch_operands = 1 : i64, tpu.core_type = #tpu.core_type<tc>, window_params = [{transform_indices = @transform_0, window_bounds = array<i64: 16, 128>}, {transform_indices = @transform_1, window_bounds = array<i64: 128, 128>}, {transform_indices = @transform_2, window_bounds = array<i64: 1, 128>}, {transform_indices = @transform_3, window_bounds = array<i64: 16, 128>}]} {
    %c0_i32 = arith.constant 0 : i32
    %0 = arith.cmpi eq, %arg2, %c0_i32 : i32
    %1 = arith.extui %0 : i1 to i32
    %c0_i32_0 = arith.constant 0 : i32
    %2 = arith.cmpi ne, %1, %c0_i32_0 : i32
    scf.if %2 {
      %cst_10 = arith.constant 0.000000e+00 : f32
      %12 = vector.broadcast %cst_10 : f32 to vector<16x128xf32>
      %c0_11 = arith.constant 0 : index
      %c0_12 = arith.constant 0 : index
      %13 = vector.load %arg7[%c0_11, %c0_12] : memref<16x128xf32, #tpu.memory_space<vmem>>, vector<16x128xf32>
      tpu.vector_store %arg7[%c0_11, %c0_12], %12 {strides = array<i32>} : memref<16x128xf32, #tpu.memory_space<vmem>>, vector<16x128xf32>,
    } else {
    }
    %c0 = arith.constant 0 : index
    %c0_1 = arith.constant 0 : index
    %3 = vector.load %arg7[%c0, %c0_1] : memref<16x128xf32, #tpu.memory_space<vmem>>, vector<16x128xf32>
    %c0_2 = arith.constant 0 : index
    %c0_3 = arith.constant 0 : index
    %4 = vector.load %arg3[%c0_2, %c0_3] : memref<16x128xbf16, #tpu.memory_space<vmem>>, vector<16x128xbf16>
    %c0_4 = arith.constant 0 : index
    %c0_5 = arith.constant 0 : index
    %5 = vector.load %arg4[%c0_4, %c0_5] : memref<128x128xbf16, #tpu.memory_space<vmem>>, vector<128x128xbf16>
    %cst = arith.constant dense<0.000000e+00> : vector<16x128xf32>
    %6 = tpu.matmul %4, %5, %cst {dimension_numbers = #tpu.dot_dimension_numbers<[1], [0], [0], [1], [0, 0, 1, 1], [], []>} : vector<16x128xbf16>, vector<128x128xbf16>, vector<16x128xf32> -> vector<16x128xf32>
    %7 = arith.addf %3, %6 : vector<16x128xf32>
    %c0_6 = arith.constant 0 : index
    %c0_7 = arith.constant 0 : index
    %8 = vector.load %arg7[%c0_6, %c0_7] : memref<16x128xf32, #tpu.memory_space<vmem>>, vector<16x128xf32>
    tpu.vector_store %arg7[%c0_6, %c0_7], %7 {strides = array<i32>} : memref<16x128xf32, #tpu.memory_space<vmem>>, vector<16x128xf32>,
    %c0_i32_8 = arith.constant 0 : i32
    %9 = arith.cmpi eq, %arg2, %c0_i32_8 : i32
    %10 = arith.extui %9 : i1 to i32
    %c0_i32_9 = arith.constant 0 : i32
    %11 = arith.cmpi ne, %10, %c0_i32_9 : i32
    scf.if %11 {
      %c0_10 = arith.constant 0 : index
      %c0_11 = arith.constant 0 : index
      %12 = vector.load %arg7[%c0_10, %c0_11] : memref<16x128xf32, #tpu.memory_space<vmem>>, vector<16x128xf32>
      %c0_12 = arith.constant 0 : index
      %c0_13 = arith.constant 0 : index
      %13 = vector.load %arg5[%c0_12, %c0_13] : memref<1x128xf32, #tpu.memory_space<vmem>>, vector<1x128xf32>
      %14 = vector.broadcast %13 : vector<1x128xf32> to vector<16x128xf32>
      %15 = arith.addf %12, %14 : vector<16x128xf32>
      %c0_14 = arith.constant 0 : index
      %c0_15 = arith.constant 0 : index
      %16 = vector.load %arg6[%c0_14, %c0_15] : memref<16x128xf32, #tpu.memory_space<vmem>>, vector<16x128xf32>
      tpu.vector_store %arg6[%c0_14, %c0_15], %15 {strides = array<i32>} : memref<16x128xf32, #tpu.memory_space<vmem>>, vector<16x128xf32>,
    } else {
    }
    return
  }
  func.func @transform_0(%arg0: i32, %arg1: i32, %arg2: i32) -> (i32, i32) {
    %c0_i32 = arith.constant 0 : i32
    return %arg0, %arg2 : i32, i32
  }
  func.func @transform_1(%arg0: i32, %arg1: i32, %arg2: i32) -> (i32, i32) {
    %c0_i32 = arith.constant 0 : i32
    return %arg2, %arg1 : i32, i32
  }
  func.func @transform_2(%arg0: i32, %arg1: i32, %arg2: i32) -> (i32, i32) {
    %c0_i32 = arith.constant 0 : i32
    %c0_i32_0 = arith.constant 0 : i32
    return %c0_i32, %arg1 : i32, i32
  }
  func.func @transform_3(%arg0: i32, %arg1: i32, %arg2: i32) -> (i32, i32) {
    %c0_i32 = arith.constant 0 : i32
    return %arg0, %arg1 : i32, i32
  }
}

module attributes {stable_mosaic.version = 11 : i64} {
  func.func @kernel(%arg0: i32, %arg1: memref<1x4x4x32xbf16, #tpu.memory_space<vmem>>, %arg2: memref<9x32x32xbf16, #tpu.memory_space<vmem>>, %arg3: memref<1x2x2x32xf32, #tpu.memory_space<vmem>>) attributes {dimension_semantics = [#tpu.dimension_semantics<parallel>], iteration_bounds = array<i64: 2>, scalar_prefetch = 0 : i64, scratch_operands = 0 : i64, tpu.core_type = #tpu.core_type<tc>, window_params = [{transform_indices = @transform_0, window_bounds = array<i64: 1, 4, 4, 32>}, {pipeline_mode = #tpu.pipeline_mode<synchronous>, transform_indices = @transform_1, window_bounds = array<i64: 9, 32, 32>}, {transform_indices = @transform_2, window_bounds = array<i64: 1, 2, 2, 32>}]} {
    %cst = arith.constant 0.000000e+00 : f32
    %0 = vector.broadcast %cst : f32 to vector<2x32xf32>
    %c0 = arith.constant 0 : index
    %c0_0 = arith.constant 0 : index
    %c0_1 = arith.constant 0 : index
    %c0_2 = arith.constant 0 : index
    %1 = vector.load %arg1[%c0, %c0_0, %c0_1, %c0_2] : memref<1x4x4x32xbf16, #tpu.memory_space<vmem>>, vector<1x1x2x32xbf16>
    %2 = vector.shape_cast %1 : vector<1x1x2x32xbf16> to vector<2x32xbf16>
    %c0_3 = arith.constant 0 : index
    %c0_4 = arith.constant 0 : index
    %c0_5 = arith.constant 0 : index
    %3 = vector.load %arg2[%c0_3, %c0_4, %c0_5] : memref<9x32x32xbf16, #tpu.memory_space<vmem>>, vector<1x32x32xbf16>
    %4 = vector.shape_cast %3 : vector<1x32x32xbf16> to vector<32x32xbf16>
    %cst_6 = arith.constant dense<0.000000e+00> : vector<2x32xf32>
    %5 = tpu.matmul %2, %4, %cst_6 {dimension_numbers = #tpu.dot_dimension_numbers<[1], [0], [0], [1], [0, 0, 1, 1], [], []>} : vector<2x32xbf16>, vector<32x32xbf16>, vector<2x32xf32> -> vector<2x32xf32>
    %6 = arith.addf %0, %5 : vector<2x32xf32>
    %c0_7 = arith.constant 0 : index
    %c0_8 = arith.constant 0 : index
    %c1 = arith.constant 1 : index
    %c0_9 = arith.constant 0 : index
    %7 = vector.load %arg1[%c0_7, %c0_8, %c1, %c0_9] : memref<1x4x4x32xbf16, #tpu.memory_space<vmem>>, vector<1x1x2x32xbf16>
    %8 = vector.shape_cast %7 : vector<1x1x2x32xbf16> to vector<2x32xbf16>
    %c1_10 = arith.constant 1 : index
    %c0_11 = arith.constant 0 : index
    %c0_12 = arith.constant 0 : index
    %9 = vector.load %arg2[%c1_10, %c0_11, %c0_12] : memref<9x32x32xbf16, #tpu.memory_space<vmem>>, vector<1x32x32xbf16>
    %10 = vector.shape_cast %9 : vector<1x32x32xbf16> to vector<32x32xbf16>
    %cst_13 = arith.constant dense<0.000000e+00> : vector<2x32xf32>
    %11 = tpu.matmul %8, %10, %cst_13 {dimension_numbers = #tpu.dot_dimension_numbers<[1], [0], [0], [1], [0, 0, 1, 1], [], []>} : vector<2x32xbf16>, vector<32x32xbf16>, vector<2x32xf32> -> vector<2x32xf32>
    %12 = arith.addf %6, %11 : vector<2x32xf32>
    %c0_14 = arith.constant 0 : index
    %c0_15 = arith.constant 0 : index
    %c2 = arith.constant 2 : index
    %c0_16 = arith.constant 0 : index
    %13 = vector.load %arg1[%c0_14, %c0_15, %c2, %c0_16] : memref<1x4x4x32xbf16, #tpu.memory_space<vmem>>, vector<1x1x2x32xbf16>
    %14 = vector.shape_cast %13 : vector<1x1x2x32xbf16> to vector<2x32xbf16>
    %c2_17 = arith.constant 2 : index
    %c0_18 = arith.constant 0 : index
    %c0_19 = arith.constant 0 : index
    %15 = vector.load %arg2[%c2_17, %c0_18, %c0_19] : memref<9x32x32xbf16, #tpu.memory_space<vmem>>, vector<1x32x32xbf16>
    %16 = vector.shape_cast %15 : vector<1x32x32xbf16> to vector<32x32xbf16>
    %cst_20 = arith.constant dense<0.000000e+00> : vector<2x32xf32>
    %17 = tpu.matmul %14, %16, %cst_20 {dimension_numbers = #tpu.dot_dimension_numbers<[1], [0], [0], [1], [0, 0, 1, 1], [], []>} : vector<2x32xbf16>, vector<32x32xbf16>, vector<2x32xf32> -> vector<2x32xf32>
    %18 = arith.addf %12, %17 : vector<2x32xf32>
    %c0_21 = arith.constant 0 : index
    %c1_22 = arith.constant 1 : index
    %c0_23 = arith.constant 0 : index
    %c0_24 = arith.constant 0 : index
    %19 = vector.load %arg1[%c0_21, %c1_22, %c0_23, %c0_24] : memref<1x4x4x32xbf16, #tpu.memory_space<vmem>>, vector<1x1x2x32xbf16>
    %20 = vector.shape_cast %19 : vector<1x1x2x32xbf16> to vector<2x32xbf16>
    %c3 = arith.constant 3 : index
    %c0_25 = arith.constant 0 : index
    %c0_26 = arith.constant 0 : index
    %21 = vector.load %arg2[%c3, %c0_25, %c0_26] : memref<9x32x32xbf16, #tpu.memory_space<vmem>>, vector<1x32x32xbf16>
    %22 = vector.shape_cast %21 : vector<1x32x32xbf16> to vector<32x32xbf16>
    %cst_27 = arith.constant dense<0.000000e+00> : vector<2x32xf32>
    %23 = tpu.matmul %20, %22, %cst_27 {dimension_numbers = #tpu.dot_dimension_numbers<[1], [0], [0], [1], [0, 0, 1, 1], [], []>} : vector<2x32xbf16>, vector<32x32xbf16>, vector<2x32xf32> -> vector<2x32xf32>
    %24 = arith.addf %18, %23 : vector<2x32xf32>
    %c0_28 = arith.constant 0 : index
    %c1_29 = arith.constant 1 : index
    %c1_30 = arith.constant 1 : index
    %c0_31 = arith.constant 0 : index
    %25 = vector.load %arg1[%c0_28, %c1_29, %c1_30, %c0_31] : memref<1x4x4x32xbf16, #tpu.memory_space<vmem>>, vector<1x1x2x32xbf16>
    %26 = vector.shape_cast %25 : vector<1x1x2x32xbf16> to vector<2x32xbf16>
    %c4 = arith.constant 4 : index
    %c0_32 = arith.constant 0 : index
    %c0_33 = arith.constant 0 : index
    %27 = vector.load %arg2[%c4, %c0_32, %c0_33] : memref<9x32x32xbf16, #tpu.memory_space<vmem>>, vector<1x32x32xbf16>
    %28 = vector.shape_cast %27 : vector<1x32x32xbf16> to vector<32x32xbf16>
    %cst_34 = arith.constant dense<0.000000e+00> : vector<2x32xf32>
    %29 = tpu.matmul %26, %28, %cst_34 {dimension_numbers = #tpu.dot_dimension_numbers<[1], [0], [0], [1], [0, 0, 1, 1], [], []>} : vector<2x32xbf16>, vector<32x32xbf16>, vector<2x32xf32> -> vector<2x32xf32>
    %30 = arith.addf %24, %29 : vector<2x32xf32>
    %c0_35 = arith.constant 0 : index
    %c1_36 = arith.constant 1 : index
    %c2_37 = arith.constant 2 : index
    %c0_38 = arith.constant 0 : index
    %31 = vector.load %arg1[%c0_35, %c1_36, %c2_37, %c0_38] : memref<1x4x4x32xbf16, #tpu.memory_space<vmem>>, vector<1x1x2x32xbf16>
    %32 = vector.shape_cast %31 : vector<1x1x2x32xbf16> to vector<2x32xbf16>
    %c5 = arith.constant 5 : index
    %c0_39 = arith.constant 0 : index
    %c0_40 = arith.constant 0 : index
    %33 = vector.load %arg2[%c5, %c0_39, %c0_40] : memref<9x32x32xbf16, #tpu.memory_space<vmem>>, vector<1x32x32xbf16>
    %34 = vector.shape_cast %33 : vector<1x32x32xbf16> to vector<32x32xbf16>
    %cst_41 = arith.constant dense<0.000000e+00> : vector<2x32xf32>
    %35 = tpu.matmul %32, %34, %cst_41 {dimension_numbers = #tpu.dot_dimension_numbers<[1], [0], [0], [1], [0, 0, 1, 1], [], []>} : vector<2x32xbf16>, vector<32x32xbf16>, vector<2x32xf32> -> vector<2x32xf32>
    %36 = arith.addf %30, %35 : vector<2x32xf32>
    %c0_42 = arith.constant 0 : index
    %c2_43 = arith.constant 2 : index
    %c0_44 = arith.constant 0 : index
    %c0_45 = arith.constant 0 : index
    %37 = vector.load %arg1[%c0_42, %c2_43, %c0_44, %c0_45] : memref<1x4x4x32xbf16, #tpu.memory_space<vmem>>, vector<1x1x2x32xbf16>
    %38 = vector.shape_cast %37 : vector<1x1x2x32xbf16> to vector<2x32xbf16>
    %c6 = arith.constant 6 : index
    %c0_46 = arith.constant 0 : index
    %c0_47 = arith.constant 0 : index
    %39 = vector.load %arg2[%c6, %c0_46, %c0_47] : memref<9x32x32xbf16, #tpu.memory_space<vmem>>, vector<1x32x32xbf16>
    %40 = vector.shape_cast %39 : vector<1x32x32xbf16> to vector<32x32xbf16>
    %cst_48 = arith.constant dense<0.000000e+00> : vector<2x32xf32>
    %41 = tpu.matmul %38, %40, %cst_48 {dimension_numbers = #tpu.dot_dimension_numbers<[1], [0], [0], [1], [0, 0, 1, 1], [], []>} : vector<2x32xbf16>, vector<32x32xbf16>, vector<2x32xf32> -> vector<2x32xf32>
    %42 = arith.addf %36, %41 : vector<2x32xf32>
    %c0_49 = arith.constant 0 : index
    %c2_50 = arith.constant 2 : index
    %c1_51 = arith.constant 1 : index
    %c0_52 = arith.constant 0 : index
    %43 = vector.load %arg1[%c0_49, %c2_50, %c1_51, %c0_52] : memref<1x4x4x32xbf16, #tpu.memory_space<vmem>>, vector<1x1x2x32xbf16>
    %44 = vector.shape_cast %43 : vector<1x1x2x32xbf16> to vector<2x32xbf16>
    %c7 = arith.constant 7 : index
    %c0_53 = arith.constant 0 : index
    %c0_54 = arith.constant 0 : index
    %45 = vector.load %arg2[%c7, %c0_53, %c0_54] : memref<9x32x32xbf16, #tpu.memory_space<vmem>>, vector<1x32x32xbf16>
    %46 = vector.shape_cast %45 : vector<1x32x32xbf16> to vector<32x32xbf16>
    %cst_55 = arith.constant dense<0.000000e+00> : vector<2x32xf32>
    %47 = tpu.matmul %44, %46, %cst_55 {dimension_numbers = #tpu.dot_dimension_numbers<[1], [0], [0], [1], [0, 0, 1, 1], [], []>} : vector<2x32xbf16>, vector<32x32xbf16>, vector<2x32xf32> -> vector<2x32xf32>
    %48 = arith.addf %42, %47 : vector<2x32xf32>
    %c0_56 = arith.constant 0 : index
    %c2_57 = arith.constant 2 : index
    %c2_58 = arith.constant 2 : index
    %c0_59 = arith.constant 0 : index
    %49 = vector.load %arg1[%c0_56, %c2_57, %c2_58, %c0_59] : memref<1x4x4x32xbf16, #tpu.memory_space<vmem>>, vector<1x1x2x32xbf16>
    %50 = vector.shape_cast %49 : vector<1x1x2x32xbf16> to vector<2x32xbf16>
    %c8 = arith.constant 8 : index
    %c0_60 = arith.constant 0 : index
    %c0_61 = arith.constant 0 : index
    %51 = vector.load %arg2[%c8, %c0_60, %c0_61] : memref<9x32x32xbf16, #tpu.memory_space<vmem>>, vector<1x32x32xbf16>
    %52 = vector.shape_cast %51 : vector<1x32x32xbf16> to vector<32x32xbf16>
    %cst_62 = arith.constant dense<0.000000e+00> : vector<2x32xf32>
    %53 = tpu.matmul %50, %52, %cst_62 {dimension_numbers = #tpu.dot_dimension_numbers<[1], [0], [0], [1], [0, 0, 1, 1], [], []>} : vector<2x32xbf16>, vector<32x32xbf16>, vector<2x32xf32> -> vector<2x32xf32>
    %54 = arith.addf %48, %53 : vector<2x32xf32>
    %c0_63 = arith.constant 0 : index
    %c0_64 = arith.constant 0 : index
    %c0_65 = arith.constant 0 : index
    %c0_66 = arith.constant 0 : index
    %55 = vector.load %arg3[%c0_63, %c0_64, %c0_65, %c0_66] : memref<1x2x2x32xf32, #tpu.memory_space<vmem>>, vector<1x1x2x32xf32>
    %56 = vector.shape_cast %55 : vector<1x1x2x32xf32> to vector<2x32xf32>
    %57 = vector.shape_cast %54 : vector<2x32xf32> to vector<1x1x2x32xf32>
    tpu.vector_store %arg3[%c0_63, %c0_64, %c0_65, %c0_66], %57 {strides = array<i32>} : memref<1x2x2x32xf32, #tpu.memory_space<vmem>>, vector<1x1x2x32xf32>,
    %cst_67 = arith.constant 0.000000e+00 : f32
    %58 = vector.broadcast %cst_67 : f32 to vector<2x32xf32>
    %c0_68 = arith.constant 0 : index
    %c1_69 = arith.constant 1 : index
    %c0_70 = arith.constant 0 : index
    %c0_71 = arith.constant 0 : index
    %59 = vector.load %arg1[%c0_68, %c1_69, %c0_70, %c0_71] : memref<1x4x4x32xbf16, #tpu.memory_space<vmem>>, vector<1x1x2x32xbf16>
    %60 = vector.shape_cast %59 : vector<1x1x2x32xbf16> to vector<2x32xbf16>
    %c0_72 = arith.constant 0 : index
    %c0_73 = arith.constant 0 : index
    %c0_74 = arith.constant 0 : index
    %61 = vector.load %arg2[%c0_72, %c0_73, %c0_74] : memref<9x32x32xbf16, #tpu.memory_space<vmem>>, vector<1x32x32xbf16>
    %62 = vector.shape_cast %61 : vector<1x32x32xbf16> to vector<32x32xbf16>
    %cst_75 = arith.constant dense<0.000000e+00> : vector<2x32xf32>
    %63 = tpu.matmul %60, %62, %cst_75 {dimension_numbers = #tpu.dot_dimension_numbers<[1], [0], [0], [1], [0, 0, 1, 1], [], []>} : vector<2x32xbf16>, vector<32x32xbf16>, vector<2x32xf32> -> vector<2x32xf32>
    %64 = arith.addf %58, %63 : vector<2x32xf32>
    %c0_76 = arith.constant 0 : index
    %c1_77 = arith.constant 1 : index
    %c1_78 = arith.constant 1 : index
    %c0_79 = arith.constant 0 : index
    %65 = vector.load %arg1[%c0_76, %c1_77, %c1_78, %c0_79] : memref<1x4x4x32xbf16, #tpu.memory_space<vmem>>, vector<1x1x2x32xbf16>
    %66 = vector.shape_cast %65 : vector<1x1x2x32xbf16> to vector<2x32xbf16>
    %c1_80 = arith.constant 1 : index
    %c0_81 = arith.constant 0 : index
    %c0_82 = arith.constant 0 : index
    %67 = vector.load %arg2[%c1_80, %c0_81, %c0_82] : memref<9x32x32xbf16, #tpu.memory_space<vmem>>, vector<1x32x32xbf16>
    %68 = vector.shape_cast %67 : vector<1x32x32xbf16> to vector<32x32xbf16>
    %cst_83 = arith.constant dense<0.000000e+00> : vector<2x32xf32>
    %69 = tpu.matmul %66, %68, %cst_83 {dimension_numbers = #tpu.dot_dimension_numbers<[1], [0], [0], [1], [0, 0, 1, 1], [], []>} : vector<2x32xbf16>, vector<32x32xbf16>, vector<2x32xf32> -> vector<2x32xf32>
    %70 = arith.addf %64, %69 : vector<2x32xf32>
    %c0_84 = arith.constant 0 : index
    %c1_85 = arith.constant 1 : index
    %c2_86 = arith.constant 2 : index
    %c0_87 = arith.constant 0 : index
    %71 = vector.load %arg1[%c0_84, %c1_85, %c2_86, %c0_87] : memref<1x4x4x32xbf16, #tpu.memory_space<vmem>>, vector<1x1x2x32xbf16>
    %72 = vector.shape_cast %71 : vector<1x1x2x32xbf16> to vector<2x32xbf16>
    %c2_88 = arith.constant 2 : index
    %c0_89 = arith.constant 0 : index
    %c0_90 = arith.constant 0 : index
    %73 = vector.load %arg2[%c2_88, %c0_89, %c0_90] : memref<9x32x32xbf16, #tpu.memory_space<vmem>>, vector<1x32x32xbf16>
    %74 = vector.shape_cast %73 : vector<1x32x32xbf16> to vector<32x32xbf16>
    %cst_91 = arith.constant dense<0.000000e+00> : vector<2x32xf32>
    %75 = tpu.matmul %72, %74, %cst_91 {dimension_numbers = #tpu.dot_dimension_numbers<[1], [0], [0], [1], [0, 0, 1, 1], [], []>} : vector<2x32xbf16>, vector<32x32xbf16>, vector<2x32xf32> -> vector<2x32xf32>
    %76 = arith.addf %70, %75 : vector<2x32xf32>
    %c0_92 = arith.constant 0 : index
    %c2_93 = arith.constant 2 : index
    %c0_94 = arith.constant 0 : index
    %c0_95 = arith.constant 0 : index
    %77 = vector.load %arg1[%c0_92, %c2_93, %c0_94, %c0_95] : memref<1x4x4x32xbf16, #tpu.memory_space<vmem>>, vector<1x1x2x32xbf16>
    %78 = vector.shape_cast %77 : vector<1x1x2x32xbf16> to vector<2x32xbf16>
    %c3_96 = arith.constant 3 : index
    %c0_97 = arith.constant 0 : index
    %c0_98 = arith.constant 0 : index
    %79 = vector.load %arg2[%c3_96, %c0_97, %c0_98] : memref<9x32x32xbf16, #tpu.memory_space<vmem>>, vector<1x32x32xbf16>
    %80 = vector.shape_cast %79 : vector<1x32x32xbf16> to vector<32x32xbf16>
    %cst_99 = arith.constant dense<0.000000e+00> : vector<2x32xf32>
    %81 = tpu.matmul %78, %80, %cst_99 {dimension_numbers = #tpu.dot_dimension_numbers<[1], [0], [0], [1], [0, 0, 1, 1], [], []>} : vector<2x32xbf16>, vector<32x32xbf16>, vector<2x32xf32> -> vector<2x32xf32>
    %82 = arith.addf %76, %81 : vector<2x32xf32>
    %c0_100 = arith.constant 0 : index
    %c2_101 = arith.constant 2 : index
    %c1_102 = arith.constant 1 : index
    %c0_103 = arith.constant 0 : index
    %83 = vector.load %arg1[%c0_100, %c2_101, %c1_102, %c0_103] : memref<1x4x4x32xbf16, #tpu.memory_space<vmem>>, vector<1x1x2x32xbf16>
    %84 = vector.shape_cast %83 : vector<1x1x2x32xbf16> to vector<2x32xbf16>
    %c4_104 = arith.constant 4 : index
    %c0_105 = arith.constant 0 : index
    %c0_106 = arith.constant 0 : index
    %85 = vector.load %arg2[%c4_104, %c0_105, %c0_106] : memref<9x32x32xbf16, #tpu.memory_space<vmem>>, vector<1x32x32xbf16>
    %86 = vector.shape_cast %85 : vector<1x32x32xbf16> to vector<32x32xbf16>
    %cst_107 = arith.constant dense<0.000000e+00> : vector<2x32xf32>
    %87 = tpu.matmul %84, %86, %cst_107 {dimension_numbers = #tpu.dot_dimension_numbers<[1], [0], [0], [1], [0, 0, 1, 1], [], []>} : vector<2x32xbf16>, vector<32x32xbf16>, vector<2x32xf32> -> vector<2x32xf32>
    %88 = arith.addf %82, %87 : vector<2x32xf32>
    %c0_108 = arith.constant 0 : index
    %c2_109 = arith.constant 2 : index
    %c2_110 = arith.constant 2 : index
    %c0_111 = arith.constant 0 : index
    %89 = vector.load %arg1[%c0_108, %c2_109, %c2_110, %c0_111] : memref<1x4x4x32xbf16, #tpu.memory_space<vmem>>, vector<1x1x2x32xbf16>
    %90 = vector.shape_cast %89 : vector<1x1x2x32xbf16> to vector<2x32xbf16>
    %c5_112 = arith.constant 5 : index
    %c0_113 = arith.constant 0 : index
    %c0_114 = arith.constant 0 : index
    %91 = vector.load %arg2[%c5_112, %c0_113, %c0_114] : memref<9x32x32xbf16, #tpu.memory_space<vmem>>, vector<1x32x32xbf16>
    %92 = vector.shape_cast %91 : vector<1x32x32xbf16> to vector<32x32xbf16>
    %cst_115 = arith.constant dense<0.000000e+00> : vector<2x32xf32>
    %93 = tpu.matmul %90, %92, %cst_115 {dimension_numbers = #tpu.dot_dimension_numbers<[1], [0], [0], [1], [0, 0, 1, 1], [], []>} : vector<2x32xbf16>, vector<32x32xbf16>, vector<2x32xf32> -> vector<2x32xf32>
    %94 = arith.addf %88, %93 : vector<2x32xf32>
    %c0_116 = arith.constant 0 : index
    %c3_117 = arith.constant 3 : index
    %c0_118 = arith.constant 0 : index
    %c0_119 = arith.constant 0 : index
    %95 = vector.load %arg1[%c0_116, %c3_117, %c0_118, %c0_119] : memref<1x4x4x32xbf16, #tpu.memory_space<vmem>>, vector<1x1x2x32xbf16>
    %96 = vector.shape_cast %95 : vector<1x1x2x32xbf16> to vector<2x32xbf16>
    %c6_120 = arith.constant 6 : index
    %c0_121 = arith.constant 0 : index
    %c0_122 = arith.constant 0 : index
    %97 = vector.load %arg2[%c6_120, %c0_121, %c0_122] : memref<9x32x32xbf16, #tpu.memory_space<vmem>>, vector<1x32x32xbf16>
    %98 = vector.shape_cast %97 : vector<1x32x32xbf16> to vector<32x32xbf16>
    %cst_123 = arith.constant dense<0.000000e+00> : vector<2x32xf32>
    %99 = tpu.matmul %96, %98, %cst_123 {dimension_numbers = #tpu.dot_dimension_numbers<[1], [0], [0], [1], [0, 0, 1, 1], [], []>} : vector<2x32xbf16>, vector<32x32xbf16>, vector<2x32xf32> -> vector<2x32xf32>
    %100 = arith.addf %94, %99 : vector<2x32xf32>
    %c0_124 = arith.constant 0 : index
    %c3_125 = arith.constant 3 : index
    %c1_126 = arith.constant 1 : index
    %c0_127 = arith.constant 0 : index
    %101 = vector.load %arg1[%c0_124, %c3_125, %c1_126, %c0_127] : memref<1x4x4x32xbf16, #tpu.memory_space<vmem>>, vector<1x1x2x32xbf16>
    %102 = vector.shape_cast %101 : vector<1x1x2x32xbf16> to vector<2x32xbf16>
    %c7_128 = arith.constant 7 : index
    %c0_129 = arith.constant 0 : index
    %c0_130 = arith.constant 0 : index
    %103 = vector.load %arg2[%c7_128, %c0_129, %c0_130] : memref<9x32x32xbf16, #tpu.memory_space<vmem>>, vector<1x32x32xbf16>
    %104 = vector.shape_cast %103 : vector<1x32x32xbf16> to vector<32x32xbf16>
    %cst_131 = arith.constant dense<0.000000e+00> : vector<2x32xf32>
    %105 = tpu.matmul %102, %104, %cst_131 {dimension_numbers = #tpu.dot_dimension_numbers<[1], [0], [0], [1], [0, 0, 1, 1], [], []>} : vector<2x32xbf16>, vector<32x32xbf16>, vector<2x32xf32> -> vector<2x32xf32>
    %106 = arith.addf %100, %105 : vector<2x32xf32>
    %c0_132 = arith.constant 0 : index
    %c3_133 = arith.constant 3 : index
    %c2_134 = arith.constant 2 : index
    %c0_135 = arith.constant 0 : index
    %107 = vector.load %arg1[%c0_132, %c3_133, %c2_134, %c0_135] : memref<1x4x4x32xbf16, #tpu.memory_space<vmem>>, vector<1x1x2x32xbf16>
    %108 = vector.shape_cast %107 : vector<1x1x2x32xbf16> to vector<2x32xbf16>
    %c8_136 = arith.constant 8 : index
    %c0_137 = arith.constant 0 : index
    %c0_138 = arith.constant 0 : index
    %109 = vector.load %arg2[%c8_136, %c0_137, %c0_138] : memref<9x32x32xbf16, #tpu.memory_space<vmem>>, vector<1x32x32xbf16>
    %110 = vector.shape_cast %109 : vector<1x32x32xbf16> to vector<32x32xbf16>
    %cst_139 = arith.constant dense<0.000000e+00> : vector<2x32xf32>
    %111 = tpu.matmul %108, %110, %cst_139 {dimension_numbers = #tpu.dot_dimension_numbers<[1], [0], [0], [1], [0, 0, 1, 1], [], []>} : vector<2x32xbf16>, vector<32x32xbf16>, vector<2x32xf32> -> vector<2x32xf32>
    %112 = arith.addf %106, %111 : vector<2x32xf32>
    %c0_140 = arith.constant 0 : index
    %c1_141 = arith.constant 1 : index
    %c0_142 = arith.constant 0 : index
    %c0_143 = arith.constant 0 : index
    %113 = vector.load %arg3[%c0_140, %c1_141, %c0_142, %c0_143] : memref<1x2x2x32xf32, #tpu.memory_space<vmem>>, vector<1x1x2x32xf32>
    %114 = vector.shape_cast %113 : vector<1x1x2x32xf32> to vector<2x32xf32>
    %115 = vector.shape_cast %112 : vector<2x32xf32> to vector<1x1x2x32xf32>
    tpu.vector_store %arg3[%c0_140, %c1_141, %c0_142, %c0_143], %115 {strides = array<i32>} : memref<1x2x2x32xf32, #tpu.memory_space<vmem>>, vector<1x1x2x32xf32>,
    return
  }
  func.func @transform_0(%arg0: i32) -> (i32, i32, i32, i32) {
    %c0_i32 = arith.constant 0 : i32
    %c0_i32_0 = arith.constant 0 : i32
    %c0_i32_1 = arith.constant 0 : i32
    %c0_i32_2 = arith.constant 0 : i32
    return %arg0, %c0_i32, %c0_i32_0, %c0_i32_1 : i32, i32, i32, i32
  }
  func.func @transform_1(%arg0: i32) -> (i32, i32, i32) {
    %c0_i32 = arith.constant 0 : i32
    %c0_i32_0 = arith.constant 0 : i32
    %c0_i32_1 = arith.constant 0 : i32
    %c0_i32_2 = arith.constant 0 : i32
    return %c0_i32, %c0_i32_0, %c0_i32_1 : i32, i32, i32
  }
  func.func @transform_2(%arg0: i32) -> (i32, i32, i32, i32) {
    %c0_i32 = arith.constant 0 : i32
    %c0_i32_0 = arith.constant 0 : i32
    %c0_i32_1 = arith.constant 0 : i32
    %c0_i32_2 = arith.constant 0 : i32
    return %arg0, %c0_i32, %c0_i32_0, %c0_i32_1 : i32, i32, i32, i32
  }
}

</mosaic_0001>

<bundles_post_ra>
// kernel: _stage1.7
= control target key start
LH: loop header
LB: loop body
LE: loop exit
PB: predicated region body
PF: predicated region fallthrough
CT: control target
= control target key end

     0   :  { %v210_v0 = vmov 0.0   ;;  %vm211_vm0 = vmmov 0   ;;  %s268_s1 = inlined_call_operand.vmem [shape: bf16[128,128], index: 1, kind: input, shape index: {}]   ;;  %s269_s0 = inlined_call_operand.vmem [shape: bf16[16,128], index: 0, kind: input, shape index: {}]   ;;  %s270_s2 = inlined_call_operand.vmem [shape: f32[1,128], index: 2, kind: input, shape index: {}]   ;;  %s271_s3 = inlined_call_operand.vmem [shape: f32[16,128], index: 3, kind: output, shape index: {}]  }
   0x1   :  { %179 = vmatprep.subr.bf16.mxu0 %v210_v0  ;;  %v201_v1 = vld [vmem:[%s268_s1] sm:$0xff]   ;;  %195 = vmatprep.mubr.msk.bf16.mxu0 %vm211_vm0, %v210_v0  ;;  %v202_v2 = vld [vmem:[%s268_s1 + $0x8] sm:$0xff]   ;;  %v203_v3 = vld [vmem:[%s268_s1 + $0x10] sm:$0xff]  }
   0x2   :  { %180 = vmatpush3.bf16.msra.mxu0 %v201_v1  ;;  %v204_v4 = vld [vmem:[%s268_s1 + $0x18] sm:$0xff]   ;;  %v205_v5 = vld [vmem:[%s268_s1 + $0x20] sm:$0xff]   ;;  %v206_v6 = vld [vmem:[%s268_s1 + $0x28] sm:$0xff]  }
   0x3   :  { %181 = vmatprep.subr.bf16.mxu0 %v210_v0  ;;  %v207_v7 = vld [vmem:[%s268_s1 + $0x30] sm:$0xff]   ;;  %v208_v8 = vld [vmem:[%s268_s1 + $0x38] sm:$0xff]   ;;  %v209_v9 = vld [vmem:[%s269_s0] sm:$0xff]  }
   0x4   :  { %v169_v10 = vld [vmem:[%s270_s2] ss:$0 sm:$0xff] }
   0x6   :  { %182 = vmatpush3.bf16.msra.mxu0 %v202_v2 }
   0x7   :  { %183 = vmatprep.subr.bf16.mxu0 %v210_v0 }
   0xa   :  { %184 = vmatpush3.bf16.msra.mxu0 %v203_v3 }
   0xb   :  { %185 = vmatprep.subr.bf16.mxu0 %v210_v0 }
   0xe   :  { %186 = vmatpush3.bf16.msra.mxu0 %v204_v4 }
   0xf   :  { %187 = vmatprep.subr.bf16.mxu0 %v210_v0 }
  0x12   :  { %188 = vmatpush3.bf16.msra.mxu0 %v205_v5 }
  0x13   :  { %189 = vmatprep.subr.bf16.mxu0 %v210_v0 }
  0x16   :  { %190 = vmatpush3.bf16.msra.mxu0 %v206_v6 }
  0x17   :  { %191 = vmatprep.subr.bf16.mxu0 %v210_v0 }
  0x1a   :  { %192 = vmatpush3.bf16.msra.mxu0 %v207_v7 }
  0x1b   :  { %193 = vmatprep.subr.bf16.mxu0 %v210_v0 }
  0x1e   :  { %194 = vmatpush3.bf16.msra.mxu0 %v208_v8 }
  0x21   :  { %196 = vmatmul.mubr.bf16.vlgmr.msra.gmra.mrb[0].mxu0 %v209_v9 }
  0xf4   :  { %v129_v11 = vpop.f32.mrb[0].mxu0 }
  0xf5   :  { %v152_v12 = vadd.f32 %v169_v10, %v129_v11  ;;  %v197_v13 = vpop.f32.mrb[1].mxu0 }
  0xf6   :  { %v132_v14 = vpop.f32.mrb[2].mxu0 }
  0xf7   :  { %154 = vst [vmem:[%s271_s3] sm:$0xff] %v152_v12  ;;  %v153_v15 = vadd.f32 %v169_v10, %v132_v14  ;;  %v198_v16 = vpop.f32.mrb[3].mxu0 }
  0xf9   :  { %155 = vst [vmem:[%s271_s3 + $0x8] sm:$0xff] %v153_v15 }

// kernel: _stage1.5
= control target key start
LH: loop header
LB: loop body
LE: loop exit
PB: predicated region body
PF: predicated region fallthrough
CT: control target
= control target key end

     0   :  { %s1557_s9 = smov 0   ;;  %s1742_s0 = inlined_call_operand.vmem [shape: bf16[2,4,4,8], index: 0, kind: input, shape index: {}]   ;;  %s1743_s1 = inlined_call_operand.vmem [shape: bf16[9,8,32], index: 1, kind: input, shape index: {}]   ;;  %s1744_s2 = inlined_call_operand.vmem [shape: f32[2,2,2,32], index: 2, kind: output, shape index: {}]  }
   0x1 LB: > { %s1239_s10 = sadd.s32 4294967295, %s1538_s9   ;;  %p1243_p0 = scmp.ge.s32.totalorder %s1538_s9, 1  ;;  %s1538_s9 = sphi %s1557_s9, %s12_s9  }
   0x2   : > { %p112_p1 = scmp.lt.s32.totalorder %s1538_s9, 3 }
   0x4   : > { %p113_p2 = pnand %p1243_p0, %p112_p1 }
   0x5   : > { %v1248_v0 = vld [vmem:[%s1743_s1 + $0x4] sm:$0xf] (!%p113_p2)  ;;  %vm169_vm0 = vcmask (!%p113_p2), 1043456   ;;  %v1540_v2 = vmov (!%p113_p2), 0.0   ;;  %p134_p3 = scmp.lt.s32.totalorder (!%p113_p2), %s1239_s10, 1  ;;  %vm1541_vm1 = vmmov (!%p113_p2), 0  }
   0x6   : > { %116 = sbr.rel (%p113_p2) target bundleno = 335 (0x14f), region = 28  ;;  %v1279_v1 = vld [vmem:[%s1743_s1 + $0x4] sm:$0xf] (!%p113_p2)  ;;  %1350 = vmatprep.subr.bf16.mxu0 (!%p113_p2), %v1540_v2  ;;  %1404 = vmatprep.subr.bf16.mxu1 (!%p113_p2), %v1540_v2  ;;  %v171_v3 = vsel (!%p113_p2), %vm169_vm0, %v1248_v0, 0  ;;  %v146_v9 = vld [vmem:[%s1743_s1] sm:$0xf] (!%p113_p2) }
   0x7   : > { %v693_v4 = vsel (!%p113_p2), %vm169_vm0, %v1279_v1, 0  ;;  %1351 = vmatpush3.bf16.msra.mxu0 (!%p113_p2), %v171_v3  ;;  %1352 = vmatprep.mubr.msk.bf16.mxu0 (!%p113_p2), %vm1541_vm1, %v1540_v2  ;;  %v671_v13 = vld [vmem:[%s1743_s1] sm:$0xf] (!%p113_p2)  ;;  %vm165_vm2 = vcmask (!%p113_p2), 64512   ;;  %v217_v16 = vsel (!%p113_p2), %vm169_vm0, %v146_v9, 0  ;;  %vm668_vm3 = vcmask (!%p113_p2), 254976  }
   0x8   : > { %1405 = vmatpush3.bf16.msra.mxu1 (!%p113_p2), %v693_v4  ;;  %1356 = vmatprep.subr.bf16.mxu0 (!%p113_p2), %v1540_v2  ;;  %v739_v18 = vsel (!%p113_p2), %vm169_vm0, %v671_v13, 0  ;;  %v1252_v19 = vld [vmem:[%s1743_s1 + $0x8] sm:$0xf] (!%p113_p2)  ;;  %v1256_v27 = vld [vmem:[%s1743_s1 + $0xc] sm:$0xf] (!%p113_p2) }
   0x9   : > { %1406 = vmatprep.mubr.msk.bf16.mxu1 (!%p113_p2), %vm1541_vm1, %v1540_v2  ;;  %1410 = vmatprep.subr.bf16.mxu1 (!%p113_p2), %v1540_v2  ;;  %v1284_v20 = vld [vmem:[%s1743_s1 + $0x8] sm:$0xf] (!%p113_p2)  ;;  %v275_v22 = vsel (!%p113_p2), %vm169_vm0, %v1252_v19, 0  ;;  %v1288_v29 = vld [vmem:[%s1743_s1 + $0xc] sm:$0xf] (!%p113_p2)  ;;  %v326_v31 = vsel (!%p113_p2), %vm169_vm0, %v1256_v27, 0 }
   0xa   : > { %v796_v24 = vsel (!%p113_p2), %vm169_vm0, %v1284_v20, 0  ;;  %v845_v32 = vsel (!%p113_p2), %vm169_vm0, %v1288_v29, 0  ;;  %v1259_v33 = vld [vmem:[%s1743_s1 + $0x10] sm:$0xf] (!%p113_p2)  ;;  %v1263_v43 = vld [vmem:[%s1743_s1 + $0x14] sm:$0xf] (!%p113_p2) }
   0xb   : > { %v1291_v34 = vld [vmem:[%s1743_s1 + $0x10] sm:$0xf] (!%p113_p2)  ;;  %v391_v36 = vsel (!%p113_p2), %vm169_vm0, %v1259_v33, 0  ;;  %v1295_v44 = vld [vmem:[%s1743_s1 + $0x14] sm:$0xf] (!%p113_p2)  ;;  %v450_v46 = vsel (!%p113_p2), %vm169_vm0, %v1263_v43, 0 }
   0xc   : > { %v909_v39 = vsel (!%p113_p2), %vm169_vm0, %v1291_v34, 0  ;;  %v967_v47 = vsel (!%p113_p2), %vm169_vm0, %v1295_v44, 0  ;;  %v1267_v49 = vld [vmem:[%s1743_s1 + $0x18] sm:$0xf] (!%p113_p2)  ;;  %v1270_v54 = vld [vmem:[%s1743_s1 + $0x1c] sm:$0xf] (!%p113_p2) }
   0xd   : > { %s1746_s10 = smov (!%p134_p3, %s1239_s10), 1  ;;  %v1299_v50 = vld [vmem:[%s1743_s1 + $0x18] sm:$0xf]  ;;  %v501_v52 = vsel %vm169_vm0, %v1267_v49, 0  ;;  %v1302_v55 = vld [vmem:[%s1743_s1 + $0x1c] sm:$0xf] }
   0xe   : > { %s1312_s15 = sshll.u32 %s1746_s10, 3  ;;  %v1017_v53 = vsel %vm169_vm0, %v1299_v50, 0  ;;  %v566_v57 = vsel %vm169_vm0, %v1270_v54, 0  ;;  %v1081_v60 = vsel %vm169_vm0, %v1302_v55, 0  ;;  %v1274_v0 = vld [vmem:[%s1743_s1 + $0x20] sm:$0xf] }
   0xf   : > { %s1587_s18 = scalar_lea.vmem %s1742_s0, %s1312_s15  ;;  %v1306_v1 = vld [vmem:[%s1743_s1 + $0x20] sm:$0xf]  ;;  %v625_v4 = vsel %vm169_vm0, %v1274_v0, 0  ;;  %s1313_s26 = sshll.u32 %s1746_s10, 2 }
  0x10   : > { %v1249_v5 = vld.sshfl [vmem:[%s1587_s18] sm:$0x3 pattern:$0x76325410]  ;;  %v1277_v23 = vld [vmem:[%s1587_s18 + $0x2] sm:$0x1]  ;;  %s143_s29 = scalar_lea.vmem %s1744_s2, %s1313_s26 }
  0x11   : > { %v159_v6 = vshrl.u32 %v1249_v5, 16  ;;  %v161_v7 = vshll.u32 %v1249_v5, 16  ;;  %v1280_v8 = vld.sshfl [vmem:[%s1587_s18 + $0x2] sm:$0x3 pattern:$0x76325410] }
  0x12   : > { %v683_v10 = vshrl.u32 %v1280_v8, 16  ;;  %v685_v11 = vshll.u32 %v1280_v8, 16  ;;  %v145_v21 = vld [vmem:[%s1587_s18] sm:$0x1]  ;;  %v1255_v35 = vld [vmem:[%s1587_s18 + $0x2] sm:$0x1] }
  0x13   : > { %v163_v12 = vrot.slane %v161_v7, 1  ;;  %v1253_v25 = vld.sshfl [vmem:[%s1587_s18] sm:$0x2 pattern:$0x76325410]  ;;  %v1139_v5 = vsel %vm169_vm0, %v1306_v1, 0 }
  0x14   : > { %v687_v14 = vrot.slane %v685_v11, 1  ;;  %v1285_v26 = vld.sshfl [vmem:[%s1587_s18 + $0x2] sm:$0x2 pattern:$0x76325410]  ;;  %v270_v28 = vrot.slane %v1253_v25, 1 }
  0x15   : > { %v164_v15 = vor.u32 %v163_v12, %v159_v6  ;;  %v791_v30 = vrot.slane %v1285_v26, 1  ;;  %v1287_v37 = vld [vmem:[%s1587_s18 + $0x4] sm:$0x1]  ;;  %v1298_v58 = vld [vmem:[%s1587_s18 + $0x6] sm:$0x1] }
  0x16   : > { %v1598_v17 = vor.u32 %v687_v14, %v683_v10  ;;  %v1292_v38 = vld.sshfl [vmem:[%s1587_s18 + $0x4] sm:$0x3 pattern:$0x76325410] }
  0x17   : > { %1353 = vmatmul.mubr.msk.bf16.vlgmr.msra.gmra.mrb[0].mxu0 %vm165_vm2, %v164_v15  ;;  %v901_v40 = vshll.u32 %v1292_v38, 16  ;;  %v899_v41 = vshrl.u32 %v1292_v38, 16  ;;  %v1296_v48 = vld.sshfl [vmem:[%s1587_s18 + $0x4] sm:$0x2 pattern:$0x76325410] }
  0x18   : > { %1357 = vmatpush3.bf16.msra.mxu0 %v217_v16  ;;  %1407 = vmatmul.mubr.msk.bf16.vlgmr.msra.gmra.mrb[0].mxu1 %vm165_vm2, %v1598_v17  ;;  %v962_v51 = vrot.slane %v1296_v48, 1  ;;  %v1266_v56 = vld [vmem:[%s1587_s18 + $0x4] sm:$0x1] }
  0x19   : > { %1411 = vmatpush3.bf16.msra.mxu1 %v739_v18  ;;  %1358 = vmatprep.mubr.msk.bf16.mxu0 %vm1541_vm1, %v1540_v2  ;;  %v903_v42 = vrot.slane %v901_v40, 1  ;;  %v1303_v59 = vld.sshfl [vmem:[%s1587_s18 + $0x6] sm:$0x3 pattern:$0x76325410] }
  0x1a   : > { %1362 = vmatprep.subr.bf16.mxu0 %v1540_v2  ;;  %1412 = vmatprep.mubr.msk.bf16.mxu1 %vm1541_vm1, %v1540_v2  ;;  %v1073_v61 = vshll.u32 %v1303_v59, 16  ;;  %v1071_v62 = vshrl.u32 %v1303_v59, 16  ;;  %v1307_v6 = vld.sshfl [vmem:[%s1587_s18 + $0x6] sm:$0x2 pattern:$0x76325410] }
  0x1b   : > { %1416 = vmatprep.subr.bf16.mxu1 %v1540_v2  ;;  %v904_v45 = vor.u32 %v903_v42, %v899_v41  ;;  %v1134_v7 = vrot.slane %v1307_v6, 1 }
  0x1c   : > { %v1075_v63 = vrot.slane %v1073_v61, 1 }
  0x1e   : > { %v1076_v3 = vor.u32 %v1075_v63, %v1071_v62 }
  0x23   : > { %1359 = vmatmul.mubr.msk.bf16.vlgmr.msra.gmra.mrb[0].mxu0 %vm165_vm2, %v145_v21 }
  0x24   : > { %1363 = vmatpush3.bf16.msra.mxu0 %v275_v22  ;;  %1413 = vmatmul.mubr.msk.bf16.vlgmr.msra.gmra.mrb[0].mxu1 %vm165_vm2, %v1277_v23 }
  0x25   : > { %1417 = vmatpush3.bf16.msra.mxu1 %v796_v24  ;;  %1364 = vmatprep.mubr.msk.bf16.mxu0 %vm1541_vm1, %v1540_v2 }
  0x26   : > { %1368 = vmatprep.subr.bf16.mxu0 %v1540_v2  ;;  %1418 = vmatprep.mubr.msk.bf16.mxu1 %vm1541_vm1, %v1540_v2 }
  0x27   : > { %1422 = vmatprep.subr.bf16.mxu1 %v1540_v2 }
  0x2f   : > { %1365 = vmatmul.mubr.msk.bf16.vlgmr.msra.gmra.mrb[0].mxu0 %vm165_vm2, %v270_v28 }
  0x30   : > { %1369 = vmatpush3.bf16.msra.mxu0 %v326_v31  ;;  %1419 = vmatmul.mubr.msk.bf16.vlgmr.msra.gmra.mrb[0].mxu1 %vm165_vm2, %v791_v30 }
  0x31   : > { %1423 = vmatpush3.bf16.msra.mxu1 %v845_v32  ;;  %1370 = vmatprep.mubr.msk.bf16.mxu0 %vm1541_vm1, %v1540_v2 }
  0x32   : > { %1374 = vmatprep.subr.bf16.mxu0 %v1540_v2  ;;  %1424 = vmatprep.mubr.msk.bf16.mxu1 %vm1541_vm1, %v1540_v2 }
  0x33   : > { %1428 = vmatprep.subr.bf16.mxu1 %v1540_v2 }
  0x3b   : > { %1371 = vmatmul.mubr.msk.bf16.vlgmr.msra.gmra.mrb[0].mxu0 %vm165_vm2, %v1255_v35 }
  0x3c   : > { %1375 = vmatpush3.bf16.msra.mxu0 %v391_v36  ;;  %1425 = vmatmul.mubr.msk.bf16.vlgmr.msra.gmra.mrb[0].mxu1 %vm165_vm2, %v1287_v37 }
  0x3d   : > { %1429 = vmatpush3.bf16.msra.mxu1 %v909_v39  ;;  %1376 = vmatprep.mubr.msk.bf16.mxu0 %vm1541_vm1, %v1540_v2 }
  0x3e   : > { %1380 = vmatprep.subr.bf16.mxu0 %v1540_v2  ;;  %1430 = vmatprep.mubr.msk.bf16.mxu1 %vm1541_vm1, %v1540_v2 }
  0x3f   : > { %1434 = vmatprep.subr.bf16.mxu1 %v1540_v2 }
  0x47   : > { %1377 = vmatmul.mubr.msk.bf16.vlgmr.msra.gmra.mrb[0].mxu0 %vm165_vm2, %v1598_v17 }
  0x48   : > { %1381 = vmatpush3.bf16.msra.mxu0 %v450_v46  ;;  %1431 = vmatmul.mubr.msk.bf16.vlgmr.msra.gmra.mrb[0].mxu1 %vm165_vm2, %v904_v45 }
  0x49   : > { %1435 = vmatpush3.bf16.msra.mxu1 %v967_v47  ;;  %1382 = vmatprep.mubr.msk.bf16.mxu0 %vm1541_vm1, %v1540_v2 }
  0x4a   : > { %1386 = vmatprep.subr.bf16.mxu0 %v1540_v2  ;;  %1436 = vmatprep.mubr.msk.bf16.mxu1 %vm1541_vm1, %v1540_v2 }
  0x4b   : > { %1440 = vmatprep.subr.bf16.mxu1 %v1540_v2 }
  0x53   : > { %1383 = vmatmul.mubr.msk.bf16.vlgmr.msra.gmra.mrb[0].mxu0 %vm165_vm2, %v791_v30 }
  0x54   : > { %1387 = vmatpush3.bf16.msra.mxu0 %v501_v52  ;;  %1437 = vmatmul.mubr.msk.bf16.vlgmr.msra.gmra.mrb[0].mxu1 %vm165_vm2, %v962_v51 }
  0x55   : > { %1441 = vmatpush3.bf16.msra.mxu1 %v1017_v53  ;;  %1388 = vmatprep.mubr.msk.bf16.mxu0 %vm1541_vm1, %v1540_v2 }
  0x56   : > { %1392 = vmatprep.subr.bf16.mxu0 %v1540_v2  ;;  %1442 = vmatprep.mubr.msk.bf16.mxu1 %vm1541_vm1, %v1540_v2 }
  0x57   : > { %1446 = vmatprep.subr.bf16.mxu1 %v1540_v2 }
  0x5f   : > { %1389 = vmatmul.mubr.msk.bf16.vlgmr.msra.gmra.mrb[0].mxu0 %vm165_vm2, %v1266_v56 }
  0x60   : > { %1393 = vmatpush3.bf16.msra.mxu0 %v566_v57  ;;  %1443 = vmatmul.mubr.msk.bf16.vlgmr.msra.gmra.mrb[0].mxu1 %vm165_vm2, %v1298_v58 }
  0x61   : > { %1447 = vmatpush3.bf16.msra.mxu1 %v1081_v60  ;;  %1394 = vmatprep.mubr.msk.bf16.mxu0 %vm1541_vm1, %v1540_v2 }
  0x62   : > { %1398 = vmatprep.subr.bf16.mxu0 %v1540_v2  ;;  %1448 = vmatprep.mubr.msk.bf16.mxu1 %vm1541_vm1, %v1540_v2 }
  0x63   : > { %1452 = vmatprep.subr.bf16.mxu1 %v1540_v2 }
  0x6b   : > { %1395 = vmatmul.mubr.msk.bf16.vlgmr.msra.gmra.mrb[0].mxu0 %vm165_vm2, %v904_v45 }
  0x6c   : > { %1399 = vmatpush3.bf16.msra.mxu0 %v625_v4  ;;  %1449 = vmatmul.mubr.msk.bf16.vlgmr.msra.gmra.mrb[0].mxu1 %vm165_vm2, %v1076_v3 }
  0x6d   : > { %1453 = vmatpush3.bf16.msra.mxu1 %v1139_v5  ;;  %1400 = vmatprep.mubr.msk.bf16.mxu0 %vm1541_vm1, %v1540_v2 }
  0x6e   : > { %1454 = vmatprep.mubr.msk.bf16.mxu1 %vm1541_vm1, %v1540_v2 }
  0x77   : > { %1401 = vmatmul.mubr.msk.bf16.vlgmr.msra.gmra.mrb[0].mxu0 %vm165_vm2, %v962_v51 }
  0x78   : > { %1455 = vmatmul.mubr.msk.bf16.vlgmr.msra.gmra.mrb[0].mxu1 %vm165_vm2, %v1134_v7 }
 0x14a   : > { %v661_v8 = vpop.f32.mrb[0].mxu0 }
 0x14b   : > { %669 = vst.msk [vmem:[%s143_s29] sm:$0x3] %vm668_vm3, %v661_v8  ;;  %v1175_v9 = vpop.f32.mrb[0].mxu1  ;;  %v1402_v10 = vpop.f32.mrb[1].mxu0 }
 0x14c   : > { %1309 = vst.msk [vmem:[%s143_s29 + $0x2] sm:$0x3] %vm668_vm3, %v1175_v9  ;;  %v1456_v11 = vpop.f32.mrb[1].mxu1  ;;  %v664_v12 = vpop.f32.mrb[2].mxu0 }
 0x14d   : > { %v1178_v2 = vpop.f32.mrb[2].mxu1  ;;  %v1403_v13 = vpop.f32.mrb[3].mxu0 }
 0x14e   : > { %v1457_v14 = vpop.f32.mrb[3].mxu1 }
 0x14f PF: > { %s12_s9 = sadd.s32 1, %s1538_s9  }
 0x150   : > { %p9_p4 = scmp.ge.s32.totalorder %s12_s9, 4  }
 0x152   :  { %11 = sbr.rel (!%p9_p4) target bundleno = 1 (0x1), region = 70 }

// kernel: _stage1.6
= control target key start
LH: loop header
LB: loop body
LE: loop exit
PB: predicated region body
PF: predicated region fallthrough
CT: control target
= control target key end

     0   :  { %s1946_s9 = smov 0   ;;  %s2188_s0 = inlined_call_operand.vmem [shape: bf16[2,4,4,32], index: 0, kind: input, shape index: {}]   ;;  %s2189_s1 = inlined_call_operand.vmem [shape: bf16[9,32,32], index: 1, kind: input, shape index: {}]   ;;  %s2190_s2 = inlined_call_operand.vmem [shape: f32[2,2,2,32], index: 2, kind: output, shape index: {}]  }
   0x1 LB: > { %s1454_s10 = sadd.s32 4294967295, %s1927_s9   ;;  %p1458_p0 = scmp.ge.s32.totalorder %s1927_s9, 1  ;;  %s1927_s9 = sphi %s1946_s9, %s12_s9  }
   0x2   : > { %p112_p1 = scmp.lt.s32.totalorder %s1927_s9, 3 }
   0x4   : > { %p113_p2 = pnand %p1458_p0, %p112_p1 }
   0x5   : > { %v1885_v0 = vld [vmem:[%s2189_s1 + $0x10] sm:$0xff] (!%p113_p2)   ;;  %v1929_v1 = vmov (!%p113_p2), 0.0   ;;  %v1887_v3 = vld [vmem:[%s2189_s1 + $0x18] sm:$0xff] (!%p113_p2)   ;;  %vm1930_vm0 = vmmov (!%p113_p2), 0   ;;  %p134_p3 = scmp.lt.s32.totalorder (!%p113_p2), %s1454_s10, 1  ;;  %vm183_vm1 = vcmask (!%p113_p2), 261120  }
   0x6   : > { %116 = sbr.rel (%p113_p2) target bundleno = 335 (0x14f), region = 28  ;;  %1667 = vmatprep.subr.bf16.mxu0 (!%p113_p2), %v1929_v1  ;;  %1739 = vmatprep.subr.bf16.mxu1 (!%p113_p2), %v1929_v1  ;;  %v1886_v2 = vld [vmem:[%s2189_s1 + $0x10] sm:$0xff] (!%p113_p2)   ;;  %v1888_v4 = vld [vmem:[%s2189_s1 + $0x18] sm:$0xff] (!%p113_p2)   ;;  %v1889_v12 = vld [vmem:[%s2189_s1] sm:$0xff] (!%p113_p2)   ;;  %vm775_vm2 = vcmask (!%p113_p2), 254976  }
   0x7   : > { %1668 = vmatpush3.bf16.msra.mxu0 (!%p113_p2), %v1885_v0  ;;  %1671 = vmatprep.mubr.msk.bf16.mxu0 (!%p113_p2), %vm1930_vm0, %v1929_v1  ;;  %v1890_v15 = vld [vmem:[%s2189_s1] sm:$0xff] (!%p113_p2)   ;;  %v1891_v17 = vld [vmem:[%s2189_s1 + $0x8] sm:$0xff] (!%p113_p2)   ;;  %v1897_v28 = vld [vmem:[%s2189_s1 + $0x30] sm:$0xff] (!%p113_p2)  }
   0x8   : > { %1740 = vmatpush3.bf16.msra.mxu1 (!%p113_p2), %v1886_v2  ;;  %1669 = vmatprep.subr.bf16.mxu0 (!%p113_p2), %v1929_v1  ;;  %v1892_v18 = vld [vmem:[%s2189_s1 + $0x8] sm:$0xff] (!%p113_p2)   ;;  %v1893_v20 = vld [vmem:[%s2189_s1 + $0x20] sm:$0xff] (!%p113_p2)   ;;  %v1898_v30 = vld [vmem:[%s2189_s1 + $0x30] sm:$0xff] (!%p113_p2)  }
   0x9   : > { %1741 = vmatprep.subr.bf16.mxu1 (!%p113_p2), %v1929_v1  ;;  %1743 = vmatprep.mubr.msk.bf16.mxu1 (!%p113_p2), %vm1930_vm0, %v1929_v1  ;;  %v1894_v22 = vld [vmem:[%s2189_s1 + $0x20] sm:$0xff] (!%p113_p2)   ;;  %v1895_v23 = vld [vmem:[%s2189_s1 + $0x28] sm:$0xff] (!%p113_p2)   ;;  %v1899_v31 = vld [vmem:[%s2189_s1 + $0x38] sm:$0xff] (!%p113_p2)  }
   0xa   : > { %v1896_v24 = vld [vmem:[%s2189_s1 + $0x28] sm:$0xff] (!%p113_p2)   ;;  %v1900_v32 = vld [vmem:[%s2189_s1 + $0x38] sm:$0xff] (!%p113_p2)   ;;  %v1901_v34 = vld [vmem:[%s2189_s1 + $0x40] sm:$0xff] (!%p113_p2)  }
   0xb   : > { %1670 = vmatpush3.bf16.msra.mxu0 (!%p113_p2), %v1887_v3  ;;  %v1902_v36 = vld [vmem:[%s2189_s1 + $0x40] sm:$0xff] (!%p113_p2)   ;;  %v1903_v38 = vld [vmem:[%s2189_s1 + $0x48] sm:$0xff] (!%p113_p2)   ;;  %v1905_v43 = vld [vmem:[%s2189_s1 + $0x50] sm:$0xff] (!%p113_p2)  }
   0xc   : > { %1742 = vmatpush3.bf16.msra.mxu1 (!%p113_p2), %v1888_v4  ;;  %1675 = vmatprep.subr.bf16.mxu0 (!%p113_p2), %v1929_v1  ;;  %v1904_v40 = vld [vmem:[%s2189_s1 + $0x48] sm:$0xff] (!%p113_p2)   ;;  %v1906_v45 = vld [vmem:[%s2189_s1 + $0x50] sm:$0xff] (!%p113_p2)   ;;  %v1907_v46 = vld [vmem:[%s2189_s1 + $0x58] sm:$0xff] (!%p113_p2)  }
   0xd   : > { %s2192_s10 = smov (!%p134_p3, %s1454_s10), 1  ;;  %1747 = vmatprep.subr.bf16.mxu1 %v1929_v1  ;;  %v1908_v47 = vld [vmem:[%s2189_s1 + $0x58] sm:$0xff]   ;;  %v1909_v49 = vld [vmem:[%s2189_s1 + $0x60] sm:$0xff]   ;;  %v1911_v52 = vld [vmem:[%s2189_s1 + $0x68] sm:$0xff]  }
   0xe   : > { %s1611_s19 = sshll.u32 %s2192_s10, 3  ;;  %v1910_v51 = vld [vmem:[%s2189_s1 + $0x60] sm:$0xff]   ;;  %v1912_v53 = vld [vmem:[%s2189_s1 + $0x68] sm:$0xff]   ;;  %v1913_v55 = vld [vmem:[%s2189_s1 + $0x70] sm:$0xff]   ;;  %s1612_s11 = sshll.u32 %s2192_s10, 2 }
   0xf   : > { %s1981_s22 = scalar_lea.vmem %s2188_s0, %s1611_s19  ;;  %v1914_v57 = vld [vmem:[%s2189_s1 + $0x70] sm:$0xff]   ;;  %v1915_v59 = vld [vmem:[%s2189_s1 + $0x78] sm:$0xff]   ;;  %v1917_v0 = vld [vmem:[%s2189_s1 + $0x80] sm:$0xff]   ;;  %s143_s14 = scalar_lea.vmem %s2190_s2, %s1612_s11 }
  0x10   : > { %v1467_v5 = vld.sshfl [vmem:[%s1981_s22] sm:$0x3 pattern:$0x76325410]  ;;  %v1534_v21 = vld [vmem:[%s1981_s22 + $0x2] sm:$0x1] }
  0x11   : > { %v165_v6 = vshrl.u32 %v1467_v5, 16  ;;  %v167_v7 = vshll.u32 %v1467_v5, 16  ;;  %v1540_v8 = vld.sshfl [vmem:[%s1981_s22 + $0x2] sm:$0x3 pattern:$0x76325410] }
  0x12   : > { %v796_v9 = vshrl.u32 %v1540_v8, 16  ;;  %v798_v10 = vshll.u32 %v1540_v8, 16  ;;  %v145_v19 = vld [vmem:[%s1981_s22] sm:$0x1]  ;;  %v1482_v33 = vld [vmem:[%s1981_s22 + $0x2] sm:$0x1] }
  0x13   : > { %v169_v11 = vrot.slane %v167_v7, 1  ;;  %v1478_v25 = vld.sshfl [vmem:[%s1981_s22] sm:$0x2 pattern:$0x76325410]  ;;  %v1916_v61 = vld [vmem:[%s2189_s1 + $0x78] sm:$0xff]  }
  0x14   : > { %v800_v13 = vrot.slane %v798_v10, 1  ;;  %v2036_v26 = vld.sshfl [vmem:[%s1981_s22 + $0x2] sm:$0x2 pattern:$0x76325410]  ;;  %v296_v27 = vrot.slane %v1478_v25, 1 }
  0x15   : > { %v170_v14 = vor.u32 %v169_v11, %v165_v6  ;;  %v925_v29 = vrot.slane %v2036_v26, 1  ;;  %v1556_v35 = vld [vmem:[%s1981_s22 + $0x4] sm:$0x1]  ;;  %v1582_v56 = vld [vmem:[%s1981_s22 + $0x6] sm:$0x1]  ;;  %v1919_v4 = vld [vmem:[%s2189_s1 + $0x88] sm:$0xff]  }
  0x16   : > { %v1992_v16 = vor.u32 %v800_v13, %v796_v9  ;;  %v1569_v37 = vld.sshfl [vmem:[%s1981_s22 + $0x4] sm:$0x3 pattern:$0x76325410]  ;;  %v1920_v5 = vld [vmem:[%s2189_s1 + $0x88] sm:$0xff]  }
  0x17   : > { %1672 = vmatmul.mubr.msk.bf16.vlgmr.msra.gmra.mrb[0].mxu0 %vm183_vm1, %v170_v14  ;;  %v1059_v39 = vshll.u32 %v1569_v37, 16  ;;  %v1057_v41 = vshrl.u32 %v1569_v37, 16  ;;  %v1578_v48 = vld.sshfl [vmem:[%s1981_s22 + $0x4] sm:$0x2 pattern:$0x76325410] }
  0x18   : > { %1676 = vmatpush3.bf16.msra.mxu0 %v1889_v12  ;;  %1744 = vmatmul.mubr.msk.bf16.vlgmr.msra.gmra.mrb[0].mxu1 %vm183_vm1, %v1992_v16  ;;  %v1132_v50 = vrot.slane %v1578_v48, 1  ;;  %v1508_v54 = vld [vmem:[%s1981_s22 + $0x4] sm:$0x1] }
  0x19   : > { %1748 = vmatpush3.bf16.msra.mxu1 %v1890_v15  ;;  %1677 = vmatprep.subr.bf16.mxu0 %v1929_v1  ;;  %v1061_v42 = vrot.slane %v1059_v39, 1  ;;  %v1595_v58 = vld.sshfl [vmem:[%s1981_s22 + $0x6] sm:$0x3 pattern:$0x76325410] }
  0x1a   : > { %1749 = vmatprep.subr.bf16.mxu1 %v1929_v1  ;;  %1679 = vmatprep.mubr.msk.bf16.mxu0 %vm1930_vm0, %v1929_v1  ;;  %v1267_v60 = vshll.u32 %v1595_v58, 16  ;;  %v1265_v62 = vshrl.u32 %v1595_v58, 16  ;;  %v1918_v3 = vld [vmem:[%s2189_s1 + $0x80] sm:$0xff]  }
  0x1b   : > { %1751 = vmatprep.mubr.msk.bf16.mxu1 %vm1930_vm0, %v1929_v1  ;;  %v1062_v44 = vor.u32 %v1061_v42, %v1057_v41  ;;  %v1604_v6 = vld.sshfl [vmem:[%s1981_s22 + $0x6] sm:$0x2 pattern:$0x76325410] }
  0x1c   : > { %1678 = vmatpush3.bf16.msra.mxu0 %v1891_v17  ;;  %v1269_v63 = vrot.slane %v1267_v60, 1  ;;  %v1340_v7 = vrot.slane %v1604_v6, 1 }
  0x1d   : > { %1750 = vmatpush3.bf16.msra.mxu1 %v1892_v18  ;;  %1683 = vmatprep.subr.bf16.mxu0 %v1929_v1 }
  0x1e   : > { %1755 = vmatprep.subr.bf16.mxu1 %v1929_v1  ;;  %v1270_v2 = vor.u32 %v1269_v63, %v1265_v62 }
  0x23   : > { %1680 = vmatmul.mubr.msk.bf16.vlgmr.msra.gmra.mrb[0].mxu0 %vm183_vm1, %v145_v19 }
  0x24   : > { %1684 = vmatpush3.bf16.msra.mxu0 %v1893_v20  ;;  %1752 = vmatmul.mubr.msk.bf16.vlgmr.msra.gmra.mrb[0].mxu1 %vm183_vm1, %v1534_v21 }
  0x25   : > { %1756 = vmatpush3.bf16.msra.mxu1 %v1894_v22  ;;  %1685 = vmatprep.subr.bf16.mxu0 %v1929_v1 }
  0x26   : > { %1757 = vmatprep.subr.bf16.mxu1 %v1929_v1  ;;  %1687 = vmatprep.mubr.msk.bf16.mxu0 %vm1930_vm0, %v1929_v1 }
  0x27   : > { %1759 = vmatprep.mubr.msk.bf16.mxu1 %vm1930_vm0, %v1929_v1 }
  0x28   : > { %1686 = vmatpush3.bf16.msra.mxu0 %v1895_v23 }
  0x29   : > { %1758 = vmatpush3.bf16.msra.mxu1 %v1896_v24  ;;  %1691 = vmatprep.subr.bf16.mxu0 %v1929_v1 }
  0x2a   : > { %1763 = vmatprep.subr.bf16.mxu1 %v1929_v1 }
  0x2f   : > { %1688 = vmatmul.mubr.msk.bf16.vlgmr.msra.gmra.mrb[0].mxu0 %vm183_vm1, %v296_v27 }
  0x30   : > { %1692 = vmatpush3.bf16.msra.mxu0 %v1897_v28  ;;  %1760 = vmatmul.mubr.msk.bf16.vlgmr.msra.gmra.mrb[0].mxu1 %vm183_vm1, %v925_v29 }
  0x31   : > { %1764 = vmatpush3.bf16.msra.mxu1 %v1898_v30  ;;  %1693 = vmatprep.subr.bf16.mxu0 %v1929_v1 }
  0x32   : > { %1765 = vmatprep.subr.bf16.mxu1 %v1929_v1  ;;  %1695 = vmatprep.mubr.msk.bf16.mxu0 %vm1930_vm0, %v1929_v1 }
  0x33   : > { %1767 = vmatprep.mubr.msk.bf16.mxu1 %vm1930_vm0, %v1929_v1 }
  0x34   : > { %1694 = vmatpush3.bf16.msra.mxu0 %v1899_v31 }
  0x35   : > { %1766 = vmatpush3.bf16.msra.mxu1 %v1900_v32  ;;  %1699 = vmatprep.subr.bf16.mxu0 %v1929_v1 }
  0x36   : > { %1771 = vmatprep.subr.bf16.mxu1 %v1929_v1 }
  0x3b   : > { %1696 = vmatmul.mubr.msk.bf16.vlgmr.msra.gmra.mrb[0].mxu0 %vm183_vm1, %v1482_v33 }
  0x3c   : > { %1700 = vmatpush3.bf16.msra.mxu0 %v1901_v34  ;;  %1768 = vmatmul.mubr.msk.bf16.vlgmr.msra.gmra.mrb[0].mxu1 %vm183_vm1, %v1556_v35 }
  0x3d   : > { %1772 = vmatpush3.bf16.msra.mxu1 %v1902_v36  ;;  %1701 = vmatprep.subr.bf16.mxu0 %v1929_v1 }
  0x3e   : > { %1773 = vmatprep.subr.bf16.mxu1 %v1929_v1  ;;  %1703 = vmatprep.mubr.msk.bf16.mxu0 %vm1930_vm0, %v1929_v1 }
  0x3f   : > { %1775 = vmatprep.mubr.msk.bf16.mxu1 %vm1930_vm0, %v1929_v1 }
  0x40   : > { %1702 = vmatpush3.bf16.msra.mxu0 %v1903_v38 }
  0x41   : > { %1774 = vmatpush3.bf16.msra.mxu1 %v1904_v40  ;;  %1707 = vmatprep.subr.bf16.mxu0 %v1929_v1 }
  0x42   : > { %1779 = vmatprep.subr.bf16.mxu1 %v1929_v1 }
  0x47   : > { %1704 = vmatmul.mubr.msk.bf16.vlgmr.msra.gmra.mrb[0].mxu0 %vm183_vm1, %v1992_v16 }
  0x48   : > { %1708 = vmatpush3.bf16.msra.mxu0 %v1905_v43  ;;  %1776 = vmatmul.mubr.msk.bf16.vlgmr.msra.gmra.mrb[0].mxu1 %vm183_vm1, %v1062_v44 }
  0x49   : > { %1780 = vmatpush3.bf16.msra.mxu1 %v1906_v45  ;;  %1709 = vmatprep.subr.bf16.mxu0 %v1929_v1 }
  0x4a   : > { %1781 = vmatprep.subr.bf16.mxu1 %v1929_v1  ;;  %1711 = vmatprep.mubr.msk.bf16.mxu0 %vm1930_vm0, %v1929_v1 }
  0x4b   : > { %1783 = vmatprep.mubr.msk.bf16.mxu1 %vm1930_vm0, %v1929_v1 }
  0x4c   : > { %1710 = vmatpush3.bf16.msra.mxu0 %v1907_v46 }
  0x4d   : > { %1782 = vmatpush3.bf16.msra.mxu1 %v1908_v47  ;;  %1715 = vmatprep.subr.bf16.mxu0 %v1929_v1 }
  0x4e   : > { %1787 = vmatprep.subr.bf16.mxu1 %v1929_v1 }
  0x53   : > { %1712 = vmatmul.mubr.msk.bf16.vlgmr.msra.gmra.mrb[0].mxu0 %vm183_vm1, %v925_v29 }
  0x54   : > { %1716 = vmatpush3.bf16.msra.mxu0 %v1909_v49  ;;  %1784 = vmatmul.mubr.msk.bf16.vlgmr.msra.gmra.mrb[0].mxu1 %vm183_vm1, %v1132_v50 }
  0x55   : > { %1788 = vmatpush3.bf16.msra.mxu1 %v1910_v51  ;;  %1717 = vmatprep.subr.bf16.mxu0 %v1929_v1 }
  0x56   : > { %1789 = vmatprep.subr.bf16.mxu1 %v1929_v1  ;;  %1719 = vmatprep.mubr.msk.bf16.mxu0 %vm1930_vm0, %v1929_v1 }
  0x57   : > { %1791 = vmatprep.mubr.msk.bf16.mxu1 %vm1930_vm0, %v1929_v1 }
  0x58   : > { %1718 = vmatpush3.bf16.msra.mxu0 %v1911_v52 }
  0x59   : > { %1790 = vmatpush3.bf16.msra.mxu1 %v1912_v53  ;;  %1723 = vmatprep.subr.bf16.mxu0 %v1929_v1 }
  0x5a   : > { %1795 = vmatprep.subr.bf16.mxu1 %v1929_v1 }
  0x5f   : > { %1720 = vmatmul.mubr.msk.bf16.vlgmr.msra.gmra.mrb[0].mxu0 %vm183_vm1, %v1508_v54 }
  0x60   : > { %1724 = vmatpush3.bf16.msra.mxu0 %v1913_v55  ;;  %1792 = vmatmul.mubr.msk.bf16.vlgmr.msra.gmra.mrb[0].mxu1 %vm183_vm1, %v1582_v56 }
  0x61   : > { %1796 = vmatpush3.bf16.msra.mxu1 %v1914_v57  ;;  %1725 = vmatprep.subr.bf16.mxu0 %v1929_v1 }
  0x62   : > { %1797 = vmatprep.subr.bf16.mxu1 %v1929_v1  ;;  %1727 = vmatprep.mubr.msk.bf16.mxu0 %vm1930_vm0, %v1929_v1 }
  0x63   : > { %1799 = vmatprep.mubr.msk.bf16.mxu1 %vm1930_vm0, %v1929_v1 }
  0x64   : > { %1726 = vmatpush3.bf16.msra.mxu0 %v1915_v59 }
  0x65   : > { %1798 = vmatpush3.bf16.msra.mxu1 %v1916_v61  ;;  %1731 = vmatprep.subr.bf16.mxu0 %v1929_v1 }
  0x66   : > { %1803 = vmatprep.subr.bf16.mxu1 %v1929_v1 }
  0x6b   : > { %1728 = vmatmul.mubr.msk.bf16.vlgmr.msra.gmra.mrb[0].mxu0 %vm183_vm1, %v1062_v44 }
  0x6c   : > { %1732 = vmatpush3.bf16.msra.mxu0 %v1917_v0  ;;  %1800 = vmatmul.mubr.msk.bf16.vlgmr.msra.gmra.mrb[0].mxu1 %vm183_vm1, %v1270_v2 }
  0x6d   : > { %1804 = vmatpush3.bf16.msra.mxu1 %v1918_v3  ;;  %1733 = vmatprep.subr.bf16.mxu0 %v1929_v1 }
  0x6e   : > { %1805 = vmatprep.subr.bf16.mxu1 %v1929_v1  ;;  %1735 = vmatprep.mubr.msk.bf16.mxu0 %vm1930_vm0, %v1929_v1 }
  0x6f   : > { %1807 = vmatprep.mubr.msk.bf16.mxu1 %vm1930_vm0, %v1929_v1 }
  0x70   : > { %1734 = vmatpush3.bf16.msra.mxu0 %v1919_v4 }
  0x71   : > { %1806 = vmatpush3.bf16.msra.mxu1 %v1920_v5 }
  0x77   : > { %1736 = vmatmul.mubr.msk.bf16.vlgmr.msra.gmra.mrb[0].mxu0 %vm183_vm1, %v1132_v50 }
  0x78   : > { %1808 = vmatmul.mubr.msk.bf16.vlgmr.msra.gmra.mrb[0].mxu1 %vm183_vm1, %v1340_v7 }
 0x14a   : > { %v768_v8 = vpop.f32.mrb[0].mxu0 }
 0x14b   : > { %776 = vst.msk [vmem:[%s143_s14] sm:$0x3] %vm775_vm2, %v768_v8  ;;  %v1390_v9 = vpop.f32.mrb[0].mxu1  ;;  %v1737_v10 = vpop.f32.mrb[1].mxu0 }
 0x14c   : > { %1608 = vst.msk [vmem:[%s143_s14 + $0x2] sm:$0x3] %vm775_vm2, %v1390_v9  ;;  %v1809_v1 = vpop.f32.mrb[1].mxu1  ;;  %v771_v11 = vpop.f32.mrb[2].mxu0 }
 0x14d   : > { %v1393_v12 = vpop.f32.mrb[2].mxu1  ;;  %v1738_v13 = vpop.f32.mrb[3].mxu0 }
 0x14e   : > { %v1810_v14 = vpop.f32.mrb[3].mxu1 }
 0x14f PF: > { %s12_s9 = sadd.s32 1, %s1927_s9  }
 0x150   : > { %p9_p4 = scmp.ge.s32.totalorder %s12_s9, 4  }
 0x152   :  { %11 = sbr.rel (!%p9_p4) target bundleno = 1 (0x1), region = 70 }

</bundles_post_ra>
